<compile_context>
chip_gen: v6e
topology: v6e:2x2x1
jax: 0.10.0
libtpu: 0.0.40
codegen_flags: <defaults>
</compile_context>

<pallas_src>
import functools

import jax
import jax.numpy as jnp
import numpy as np
from jax.experimental import pallas as pl
from jax.experimental.pallas import tpu as pltpu


def _make_kernel(F, E, TB, cin_layers, nfilter, mlp_layers, mlp_hid):
    """Kernel body. Activations are feature-major: (E*F rows, TB batch lanes)."""
    n_in = F * E
    n_aff = cin_layers * nfilter
    last_hid = mlp_hid if mlp_layers > 0 else n_in

    def kernel(x_ref, *refs):
        # refs = [cin_w_0..L-1, mlp_w_0..m-1, const_col, out_ref]
        w_cin_refs = refs[:cin_layers]
        w_mlp_refs = refs[cin_layers:cin_layers + mlp_layers]
        const_ref = refs[cin_layers + mlp_layers]
        out_ref = refs[-1]

        # bf16 HBM stream, f32 math in-kernel (v5e VPU has no bf16).
        x = x_ref[...].astype(jnp.float32)            # (E*F, TB), rows = e*F + f
        consts = const_ref[...]                       # (n_const, 1) f32

        # ---------------- CIN ------------------------------------------------
        # The 1x1 conv / outer product is independent per embedding position e,
        # so loop over e (Python-unrolled) reusing the raw (nfilter, C) filter:
        # each matmul is lane-dense with N = TB and zero wasted FLOPs.
        w_cin = [w_cin_refs[k][...] for k in range(cin_layers)]
        layer_sums = [jnp.zeros((nfilter, TB), jnp.float32)
                      for _ in range(cin_layers)]
        for e in range(E):
            x0_e = x[e * F:(e + 1) * F, :]            # (F, TB)
            xk_e = x0_e
            n_prev = F
            for k in range(cin_layers):
                h = (x0_e[:, None, :] * xk_e[None, :, :]).reshape(F * n_prev, TB)
                conv = jnp.dot(w_cin[k], h, preferred_element_type=jnp.float32)
                xk_e = jnp.maximum(conv, 0.0)         # (nfilter, TB)
                layer_sums[k] = layer_sums[k] + xk_e  # sum over e
                n_prev = nfilter
        aff = consts[0:n_aff, :]                      # (L*nfilter, 1)
        cin_y = jnp.zeros((1, TB), jnp.float32)
        for k in range(cin_layers):
            a_k = aff[k * nfilter:(k + 1) * nfilter, :]
            cin_y = cin_y + jnp.sum(layer_sums[k] * a_k, axis=0, keepdims=True)

        # ---------------- MLP (feature-major / transposed) -------------------
        z = x                                         # (E*F, TB)
        off = n_aff
        for l in range(mlp_layers):
            Wl = w_mlp_refs[l][...]                   # (hid, fan_in)
            bl = consts[off:off + mlp_hid, :]         # (hid, 1)
            z = jnp.maximum(
                jnp.dot(Wl, z, preferred_element_type=jnp.float32) + bl, 0.0)
            off += mlp_hid
        # final (hid -> 1) projection: VPU multiply + sublane reduce
        wo = consts[off:off + last_hid, :]            # (last_hid, 1)
        bo = consts[off + last_hid:off + last_hid + 1, :]   # (1, 1)
        mlp_y = jnp.sum(z * wo, axis=0, keepdims=True) + bo

        # lane-dense (1, TB) output; the linear term is added in the glue.
        out_ref[...] = cin_y + mlp_y

    return kernel


def init_params(key, nfield, nfeat, nemb, cin_layers, nfilter,
                mlp_layers, mlp_hid):
    n_keys = 2 + cin_layers + 1 + (mlp_layers + 1)
    keys = iter(jax.random.split(key, n_keys))
    params = {}
    params['emb'] = 0.05 * jax.random.normal(next(keys), (nfeat, nemb), jnp.float32)
    params['lin_w'] = 0.05 * jax.random.normal(next(keys), (nfeat, 1), jnp.float32)

    # CIN filters: Conv1d(nfield * n_prev, nfilter, kernel_size=1, bias=False)
    cin_ws = []
    n_prev = nfield
    for _ in range(cin_layers):
        cin_ws.append(0.1 * jax.random.normal(
            next(keys), (nfilter, nfield * n_prev), jnp.float32))
        n_prev = nfilter
    params['cin_w'] = cin_ws
    n_fc = cin_layers * nfilter
    params['cin_aff'] = 0.1 * jax.random.normal(next(keys), (n_fc, 1), jnp.float32)

    # MLP: [Linear(in, hid) + ReLU (+ Dropout)] * mlp_layers, then Linear(hid, 1)
    mlp = []
    fan_in = nfield * nemb
    for _ in range(mlp_layers):
        W = 0.1 * jax.random.normal(next(keys), (mlp_hid, fan_in), jnp.float32)
        b = 0.01 * jnp.ones((mlp_hid,), jnp.float32)
        mlp.append((W, b))
        fan_in = mlp_hid
    Wo = 0.1 * jax.random.normal(next(keys), (1, fan_in), jnp.float32)
    bo = 0.01 * jnp.ones((1,), jnp.float32)
    mlp.append((Wo, bo))
    params['mlp'] = mlp
    return params


def xdeepfm_forward(ids, vals, params, *, cin_layers, nfilter,
                    mlp_layers, mlp_hid, block_b=512,
                    activation_dtype=jnp.bfloat16):
    B, F = ids.shape
    E = params['emb'].shape[1]
    n_in = F * E
    hid = mlp_hid

    # --- glue: embedding / linear-table gathers (data-dependent indexing) ----
    x_emb = params['emb'][ids] * vals[..., None]                     # (B, F, E)
    lin_y = jnp.sum(params['lin_w'][ids][..., 0] * vals, axis=1)     # (B,), exact f32

    # batch tile: large multiple of 128 (default 512, multiple of 256 for the
    # v6e/v7x MXU), clamped so a small batch is not over-padded.
    TB = max(128, min((block_b // 128) * 128, ((B + 127) // 128) * 128))
    B_pad = ((B + TB - 1) // TB) * TB
    pad = B_pad - B
    n_tiles = B_pad // TB

    # single activation stream, feature-major with e-major rows:
    #   x_fm[e*F + f, b] = x_emb[b, f, e]; batch on the 128-lane axis, bf16.
    x_fm = jnp.transpose(x_emb, (2, 1, 0)).reshape(n_in, B)
    x_fm = jnp.pad(x_fm, ((0, 0), (0, pad))).astype(activation_dtype)

    # raw CIN filters (no kron(W, I_E) expansion)
    cin_ws = [w.astype(jnp.float32) for w in params['cin_w']]

    # MLP weights; the matrix that consumes x directly has its columns permuted
    # from torch's (f*E + e) flattening to the kernel's e-major (e*F + f) rows.
    def to_emajor(W):
        o = W.shape[0]
        return W.reshape(o, F, E).transpose(0, 2, 1).reshape(o, n_in)

    mlp_w_args = []
    for l in range(mlp_layers):
        W, _ = params['mlp'][l]
        mlp_w_args.append((to_emajor(W) if l == 0 else W).astype(jnp.float32))
    Wo, bo = params['mlp'][-1]
    if mlp_layers == 0:
        Wo = to_emajor(Wo)
    last_hid = hid if mlp_layers > 0 else n_in

    # pack all lane-sparse (X,1) constants into one column (one DMA / buffer):
    # [cin affine; mlp bias_0..; w_out; b_out]
    cols = [params['cin_aff'].astype(jnp.float32)]
    for l in range(mlp_layers):
        cols.append(params['mlp'][l][1].reshape(-1, 1).astype(jnp.float32))
    cols.append(Wo.reshape(-1, 1).astype(jnp.float32))
    cols.append(bo.reshape(1, 1).astype(jnp.float32))
    const_col = jnp.concatenate(cols, axis=0)

    args = [x_fm] + cin_ws + mlp_w_args + [const_col]

    # --- specs ----------------------------------------------------------------
    def const_spec(a):
        zeros = (0,) * a.ndim
        return pl.BlockSpec(a.shape, lambda i: zeros)

    in_specs = ([pl.BlockSpec((n_in, TB), lambda i: (0, i))]
                + [const_spec(a) for a in args[1:]])
    out_specs = pl.BlockSpec((1, TB), lambda i: (0, i))
    grid = (n_tiles,)

    # --- VMEM limit from actual per-tile buffer math (clamped to [32,64] MiB) --
    itemsize_x = jnp.dtype(activation_dtype).itemsize
    x_block_bytes = n_in * TB * itemsize_x
    out_block_bytes = TB * 4
    weight_bytes = sum(int(np.prod(a.shape)) * 4 for a in args[1:])
    c_max = F * max(F, nfilter)
    inter_rows = c_max + nfilter * (cin_layers + 1) + n_in + 2 * max(hid, 1) + 4
    inter_bytes = inter_rows * TB * 4
    vmem_est = 2 * (x_block_bytes + out_block_bytes + weight_bytes) + inter_bytes
    vmem_limit = int(min(max(4 * vmem_est, 32 * 1024 * 1024), 64 * 1024 * 1024))

    # --- advisory cost estimate ------------------------------------------------
    cin_flops, n_prev = 0, F
    for _ in range(cin_layers):
        C = F * n_prev
        cin_flops += E * (C * TB + 2 * nfilter * C * TB + nfilter * TB)
        n_prev = nfilter
    cin_flops += 2 * cin_layers * nfilter * TB
    mlp_flops, fan = 0, n_in
    for _ in range(mlp_layers):
        mlp_flops += 2 * hid * fan * TB + 2 * hid * TB
        fan = hid
    mlp_flops += 2 * fan * TB + TB
    bytes_accessed = int(x_fm.size) * itemsize_x + B_pad * 4 + n_tiles * weight_bytes
    cost = pl.CostEstimate(flops=int((cin_flops + mlp_flops) * n_tiles),
                           transcendentals=0,
                           bytes_accessed=int(bytes_accessed))

    kernel = _make_kernel(F, E, TB, cin_layers, nfilter, mlp_layers, hid)
    out = pl.pallas_call(
        kernel,
        out_shape=jax.ShapeDtypeStruct((1, B_pad), jnp.float32),
        grid=grid,
        in_specs=in_specs,
        out_specs=out_specs,
        compiler_params=pltpu.CompilerParams(
            dimension_semantics=("parallel",),
            vmem_limit_bytes=vmem_limit,
            # let the gather/transpose/pad/cast producing x_fm fuse into the
            # kernel's first operand instead of an extra HBM round trip.
            allow_input_fusion=[True] + [False] * (len(args) - 1),
        ),
        cost_estimate=cost,
    )(*args)

    # linear term added here (exact f32), saving one per-step (1, TB) DMA.
    return out[0, :B] + lin_y


def xdeepfm_reference(ids, vals, params, *, cin_layers, mlp_layers):
    """Plain-JAX f32 reference mirroring the PyTorch forward."""
    B, F = ids.shape
    x_emb = params['emb'][ids] * vals[..., None]                    # (B, F, E)
    lin_y = jnp.sum(params['lin_w'][ids][..., 0] * vals, axis=1)

    x0, xk = x_emb, x_emb
    feats = []
    for k in range(cin_layers):
        h = x0[:, :, None, :] * xk[:, None, :, :]
        bsz, nf, nprev, ne = h.shape
        h = h.reshape(bsz, nf * nprev, ne)
        xk = jax.nn.relu(jnp.einsum('oc,bce->boe', params['cin_w'][k], h))
        feats.append(jnp.sum(xk, axis=-1))
    cin_y = jnp.concatenate(feats, axis=1) @ params['cin_aff']      # (B, 1)

    z = x_emb.reshape(B, -1)
    for l in range(mlp_layers):
        W, b = params['mlp'][l]                                     # (out, in), (out,)
        z = jax.nn.relu(z @ W.T + b)
    Wo, bo = params['mlp'][-1]                                      # (1, hid), (1,)
    mlp_y = z @ Wo.T + bo                                           # (B, 1)
    return lin_y + cin_y[:, 0] + mlp_y[:, 0]


if __name__ == "__main__":
    # Config consistent with the module; B=1000 -> B_pad=1024, two 512-wide
    # batch tiles: exercises pipelining, padding, and >=2 grid steps for
    # v7x megacore while staying tiny and fast.
    nfield, nfeat, nemb = 4, 64, 8
    cin_layers, nfilter = 2, 4
    mlp_layers, mlp_hid, dropout = 2, 32, 0.0
    B = 1000

    key = jax.random.PRNGKey(0)
    k_param, k_id, k_val = jax.random.split(key, 3)
    params = init_params(k_param, nfield, nfeat, nemb, cin_layers, nfilter,
                         mlp_layers, mlp_hid)

    ids = jax.random.randint(k_id, (B, nfield), 0, nfeat, dtype=jnp.int32)
    vals = jax.random.uniform(k_val, (B, nfield), jnp.float32)

    fwd = functools.partial(xdeepfm_forward, cin_layers=cin_layers,
                            nfilter=nfilter, mlp_layers=mlp_layers,
                            mlp_hid=mlp_hid)
    y = jax.block_until_ready(jax.jit(fwd)(ids, vals, params))

    y_ref = xdeepfm_reference(ids, vals, params,
                              cin_layers=cin_layers, mlp_layers=mlp_layers)
    # tolerance loosened for the bf16 activation stream (weights/math are f32)
    np.testing.assert_allclose(np.asarray(y), np.asarray(y_ref),
                               rtol=2e-2, atol=5e-3)
    print("KERNEL_OK")
</pallas_src>

<mosaic_0001>
module attributes {stable_mosaic.version = 11 : i64} {
  func.func @kernel(%arg0: i32, %arg1: memref<32x512xbf16, #tpu.memory_space<vmem>>, %arg2: memref<4x16xf32, #tpu.memory_space<vmem>>, %arg3: memref<4x16xf32, #tpu.memory_space<vmem>>, %arg4: memref<32x32xf32, #tpu.memory_space<vmem>>, %arg5: memref<32x32xf32, #tpu.memory_space<vmem>>, %arg6: memref<105x1xf32, #tpu.memory_space<vmem>>, %arg7: memref<1x512xf32, #tpu.memory_space<vmem>>) attributes {dimension_semantics = [#tpu.dimension_semantics<parallel>], iteration_bounds = array<i64: 2>, scalar_prefetch = 0 : i64, scratch_operands = 0 : i64, tpu.core_type = #tpu.core_type<tc>, window_params = [{transform_indices = @transform_0, window_bounds = array<i64: 32, 512>}, {pipeline_mode = #tpu.pipeline_mode<synchronous>, transform_indices = @transform_1, window_bounds = array<i64: 4, 16>}, {pipeline_mode = #tpu.pipeline_mode<synchronous>, transform_indices = @transform_2, window_bounds = array<i64: 4, 16>}, {pipeline_mode = #tpu.pipeline_mode<synchronous>, transform_indices = @transform_3, window_bounds = array<i64: 32, 32>}, {pipeline_mode = #tpu.pipeline_mode<synchronous>, transform_indices = @transform_4, window_bounds = array<i64: 32, 32>}, {pipeline_mode = #tpu.pipeline_mode<synchronous>, transform_indices = @transform_5, window_bounds = array<i64: 105, 1>}, {transform_indices = @transform_6, window_bounds = array<i64: 1, 512>}]} {
    %c0 = arith.constant 0 : index
    %c0_0 = arith.constant 0 : index
    %0 = vector.load %arg1[%c0, %c0_0] : memref<32x512xbf16, #tpu.memory_space<vmem>>, vector<32x512xbf16>
    %1 = arith.extf %0 : vector<32x512xbf16> to vector<32x512xf32>
    %c0_1 = arith.constant 0 : index
    %c0_2 = arith.constant 0 : index
    %2 = vector.load %arg6[%c0_1, %c0_2] : memref<105x1xf32, #tpu.memory_space<vmem>>, vector<105x1xf32>
    %c0_3 = arith.constant 0 : index
    %c0_4 = arith.constant 0 : index
    %3 = vector.load %arg2[%c0_3, %c0_4] : memref<4x16xf32, #tpu.memory_space<vmem>>, vector<4x16xf32>
    %c0_5 = arith.constant 0 : index
    %c0_6 = arith.constant 0 : index
    %4 = vector.load %arg3[%c0_5, %c0_6] : memref<4x16xf32, #tpu.memory_space<vmem>>, vector<4x16xf32>
    %cst = arith.constant 0.000000e+00 : f32
    %5 = vector.broadcast %cst : f32 to vector<4x512xf32>
    %cst_7 = arith.constant 0.000000e+00 : f32
    %6 = vector.broadcast %cst_7 : f32 to vector<4x512xf32>
    %7 = vector.extract_strided_slice %1 {offsets = [0, 0], sizes = [4, 512], strides = [1, 1]} : vector<32x512xf32> to vector<4x512xf32>
    %8 = vector.shape_cast %7 : vector<4x512xf32> to vector<4x1x512xf32>
    %9 = vector.shape_cast %7 : vector<4x512xf32> to vector<1x4x512xf32>
    %10 = vector.broadcast %8 : vector<4x1x512xf32> to vector<4x4x512xf32>
    %11 = vector.broadcast %9 : vector<1x4x512xf32> to vector<4x4x512xf32>
    %12 = arith.mulf %10, %11 : vector<4x4x512xf32>
    %13 = vector.shape_cast %12 : vector<4x4x512xf32> to vector<16x512xf32>
    %cst_8 = arith.constant dense<0.000000e+00> : vector<4x512xf32>
    %14 = tpu.matmul %3, %13, %cst_8 {dimension_numbers = #tpu.dot_dimension_numbers<[1], [0], [0], [1], [0, 0, 1, 1], [], []>} : vector<4x16xf32>, vector<16x512xf32>, vector<4x512xf32> -> vector<4x512xf32>
    %cst_9 = arith.constant 0.000000e+00 : f32
    %15 = vector.broadcast %cst_9 : f32 to vector<4x512xf32>
    %16 = arith.maximumf %14, %15 : vector<4x512xf32>
    %17 = arith.addf %5, %16 : vector<4x512xf32>
    %18 = vector.shape_cast %7 : vector<4x512xf32> to vector<4x1x512xf32>
    %19 = vector.shape_cast %16 : vector<4x512xf32> to vector<1x4x512xf32>
    %20 = vector.broadcast %18 : vector<4x1x512xf32> to vector<4x4x512xf32>
    %21 = vector.broadcast %19 : vector<1x4x512xf32> to vector<4x4x512xf32>
    %22 = arith.mulf %20, %21 : vector<4x4x512xf32>
    %23 = vector.shape_cast %22 : vector<4x4x512xf32> to vector<16x512xf32>
    %cst_10 = arith.constant dense<0.000000e+00> : vector<4x512xf32>
    %24 = tpu.matmul %4, %23, %cst_10 {dimension_numbers = #tpu.dot_dimension_numbers<[1], [0], [0], [1], [0, 0, 1, 1], [], []>} : vector<4x16xf32>, vector<16x512xf32>, vector<4x512xf32> -> vector<4x512xf32>
    %cst_11 = arith.constant 0.000000e+00 : f32
    %25 = vector.broadcast %cst_11 : f32 to vector<4x512xf32>
    %26 = arith.maximumf %24, %25 : vector<4x512xf32>
    %27 = arith.addf %6, %26 : vector<4x512xf32>
    %28 = vector.extract_strided_slice %1 {offsets = [4, 0], sizes = [4, 512], strides = [1, 1]} : vector<32x512xf32> to vector<4x512xf32>
    %29 = vector.shape_cast %28 : vector<4x512xf32> to vector<4x1x512xf32>
    %30 = vector.shape_cast %28 : vector<4x512xf32> to vector<1x4x512xf32>
    %31 = vector.broadcast %29 : vector<4x1x512xf32> to vector<4x4x512xf32>
    %32 = vector.broadcast %30 : vector<1x4x512xf32> to vector<4x4x512xf32>
    %33 = arith.mulf %31, %32 : vector<4x4x512xf32>
    %34 = vector.shape_cast %33 : vector<4x4x512xf32> to vector<16x512xf32>
    %cst_12 = arith.constant dense<0.000000e+00> : vector<4x512xf32>
    %35 = tpu.matmul %3, %34, %cst_12 {dimension_numbers = #tpu.dot_dimension_numbers<[1], [0], [0], [1], [0, 0, 1, 1], [], []>} : vector<4x16xf32>, vector<16x512xf32>, vector<4x512xf32> -> vector<4x512xf32>
    %cst_13 = arith.constant 0.000000e+00 : f32
    %36 = vector.broadcast %cst_13 : f32 to vector<4x512xf32>
    %37 = arith.maximumf %35, %36 : vector<4x512xf32>
    %38 = arith.addf %17, %37 : vector<4x512xf32>
    %39 = vector.shape_cast %28 : vector<4x512xf32> to vector<4x1x512xf32>
    %40 = vector.shape_cast %37 : vector<4x512xf32> to vector<1x4x512xf32>
    %41 = vector.broadcast %39 : vector<4x1x512xf32> to vector<4x4x512xf32>
    %42 = vector.broadcast %40 : vector<1x4x512xf32> to vector<4x4x512xf32>
    %43 = arith.mulf %41, %42 : vector<4x4x512xf32>
    %44 = vector.shape_cast %43 : vector<4x4x512xf32> to vector<16x512xf32>
    %cst_14 = arith.constant dense<0.000000e+00> : vector<4x512xf32>
    %45 = tpu.matmul %4, %44, %cst_14 {dimension_numbers = #tpu.dot_dimension_numbers<[1], [0], [0], [1], [0, 0, 1, 1], [], []>} : vector<4x16xf32>, vector<16x512xf32>, vector<4x512xf32> -> vector<4x512xf32>
    %cst_15 = arith.constant 0.000000e+00 : f32
    %46 = vector.broadcast %cst_15 : f32 to vector<4x512xf32>
    %47 = arith.maximumf %45, %46 : vector<4x512xf32>
    %48 = arith.addf %27, %47 : vector<4x512xf32>
    %49 = vector.extract_strided_slice %1 {offsets = [8, 0], sizes = [4, 512], strides = [1, 1]} : vector<32x512xf32> to vector<4x512xf32>
    %50 = vector.shape_cast %49 : vector<4x512xf32> to vector<4x1x512xf32>
    %51 = vector.shape_cast %49 : vector<4x512xf32> to vector<1x4x512xf32>
    %52 = vector.broadcast %50 : vector<4x1x512xf32> to vector<4x4x512xf32>
    %53 = vector.broadcast %51 : vector<1x4x512xf32> to vector<4x4x512xf32>
    %54 = arith.mulf %52, %53 : vector<4x4x512xf32>
    %55 = vector.shape_cast %54 : vector<4x4x512xf32> to vector<16x512xf32>
    %cst_16 = arith.constant dense<0.000000e+00> : vector<4x512xf32>
    %56 = tpu.matmul %3, %55, %cst_16 {dimension_numbers = #tpu.dot_dimension_numbers<[1], [0], [0], [1], [0, 0, 1, 1], [], []>} : vector<4x16xf32>, vector<16x512xf32>, vector<4x512xf32> -> vector<4x512xf32>
    %cst_17 = arith.constant 0.000000e+00 : f32
    %57 = vector.broadcast %cst_17 : f32 to vector<4x512xf32>
    %58 = arith.maximumf %56, %57 : vector<4x512xf32>
    %59 = arith.addf %38, %58 : vector<4x512xf32>
    %60 = vector.shape_cast %49 : vector<4x512xf32> to vector<4x1x512xf32>
    %61 = vector.shape_cast %58 : vector<4x512xf32> to vector<1x4x512xf32>
    %62 = vector.broadcast %60 : vector<4x1x512xf32> to vector<4x4x512xf32>
    %63 = vector.broadcast %61 : vector<1x4x512xf32> to vector<4x4x512xf32>
    %64 = arith.mulf %62, %63 : vector<4x4x512xf32>
    %65 = vector.shape_cast %64 : vector<4x4x512xf32> to vector<16x512xf32>
    %cst_18 = arith.constant dense<0.000000e+00> : vector<4x512xf32>
    %66 = tpu.matmul %4, %65, %cst_18 {dimension_numbers = #tpu.dot_dimension_numbers<[1], [0], [0], [1], [0, 0, 1, 1], [], []>} : vector<4x16xf32>, vector<16x512xf32>, vector<4x512xf32> -> vector<4x512xf32>
    %cst_19 = arith.constant 0.000000e+00 : f32
    %67 = vector.broadcast %cst_19 : f32 to vector<4x512xf32>
    %68 = arith.maximumf %66, %67 : vector<4x512xf32>
    %69 = arith.addf %48, %68 : vector<4x512xf32>
    %70 = vector.extract_strided_slice %1 {offsets = [12, 0], sizes = [4, 512], strides = [1, 1]} : vector<32x512xf32> to vector<4x512xf32>
    %71 = vector.shape_cast %70 : vector<4x512xf32> to vector<4x1x512xf32>
    %72 = vector.shape_cast %70 : vector<4x512xf32> to vector<1x4x512xf32>
    %73 = vector.broadcast %71 : vector<4x1x512xf32> to vector<4x4x512xf32>
    %74 = vector.broadcast %72 : vector<1x4x512xf32> to vector<4x4x512xf32>
    %75 = arith.mulf %73, %74 : vector<4x4x512xf32>
    %76 = vector.shape_cast %75 : vector<4x4x512xf32> to vector<16x512xf32>
    %cst_20 = arith.constant dense<0.000000e+00> : vector<4x512xf32>
    %77 = tpu.matmul %3, %76, %cst_20 {dimension_numbers = #tpu.dot_dimension_numbers<[1], [0], [0], [1], [0, 0, 1, 1], [], []>} : vector<4x16xf32>, vector<16x512xf32>, vector<4x512xf32> -> vector<4x512xf32>
    %cst_21 = arith.constant 0.000000e+00 : f32
    %78 = vector.broadcast %cst_21 : f32 to vector<4x512xf32>
    %79 = arith.maximumf %77, %78 : vector<4x512xf32>
    %80 = arith.addf %59, %79 : vector<4x512xf32>
    %81 = vector.shape_cast %70 : vector<4x512xf32> to vector<4x1x512xf32>
    %82 = vector.shape_cast %79 : vector<4x512xf32> to vector<1x4x512xf32>
    %83 = vector.broadcast %81 : vector<4x1x512xf32> to vector<4x4x512xf32>
    %84 = vector.broadcast %82 : vector<1x4x512xf32> to vector<4x4x512xf32>
    %85 = arith.mulf %83, %84 : vector<4x4x512xf32>
    %86 = vector.shape_cast %85 : vector<4x4x512xf32> to vector<16x512xf32>
    %cst_22 = arith.constant dense<0.000000e+00> : vector<4x512xf32>
    %87 = tpu.matmul %4, %86, %cst_22 {dimension_numbers = #tpu.dot_dimension_numbers<[1], [0], [0], [1], [0, 0, 1, 1], [], []>} : vector<4x16xf32>, vector<16x512xf32>, vector<4x512xf32> -> vector<4x512xf32>
    %cst_23 = arith.constant 0.000000e+00 : f32
    %88 = vector.broadcast %cst_23 : f32 to vector<4x512xf32>
    %89 = arith.maximumf %87, %88 : vector<4x512xf32>
    %90 = arith.addf %69, %89 : vector<4x512xf32>
    %91 = vector.extract_strided_slice %1 {offsets = [16, 0], sizes = [4, 512], strides = [1, 1]} : vector<32x512xf32> to vector<4x512xf32>
    %92 = vector.shape_cast %91 : vector<4x512xf32> to vector<4x1x512xf32>
    %93 = vector.shape_cast %91 : vector<4x512xf32> to vector<1x4x512xf32>
    %94 = vector.broadcast %92 : vector<4x1x512xf32> to vector<4x4x512xf32>
    %95 = vector.broadcast %93 : vector<1x4x512xf32> to vector<4x4x512xf32>
    %96 = arith.mulf %94, %95 : vector<4x4x512xf32>
    %97 = vector.shape_cast %96 : vector<4x4x512xf32> to vector<16x512xf32>
    %cst_24 = arith.constant dense<0.000000e+00> : vector<4x512xf32>
    %98 = tpu.matmul %3, %97, %cst_24 {dimension_numbers = #tpu.dot_dimension_numbers<[1], [0], [0], [1], [0, 0, 1, 1], [], []>} : vector<4x16xf32>, vector<16x512xf32>, vector<4x512xf32> -> vector<4x512xf32>
    %cst_25 = arith.constant 0.000000e+00 : f32
    %99 = vector.broadcast %cst_25 : f32 to vector<4x512xf32>
    %100 = arith.maximumf %98, %99 : vector<4x512xf32>
    %101 = arith.addf %80, %100 : vector<4x512xf32>
    %102 = vector.shape_cast %91 : vector<4x512xf32> to vector<4x1x512xf32>
    %103 = vector.shape_cast %100 : vector<4x512xf32> to vector<1x4x512xf32>
    %104 = vector.broadcast %102 : vector<4x1x512xf32> to vector<4x4x512xf32>
    %105 = vector.broadcast %103 : vector<1x4x512xf32> to vector<4x4x512xf32>
    %106 = arith.mulf %104, %105 : vector<4x4x512xf32>
    %107 = vector.shape_cast %106 : vector<4x4x512xf32> to vector<16x512xf32>
    %cst_26 = arith.constant dense<0.000000e+00> : vector<4x512xf32>
    %108 = tpu.matmul %4, %107, %cst_26 {dimension_numbers = #tpu.dot_dimension_numbers<[1], [0], [0], [1], [0, 0, 1, 1], [], []>} : vector<4x16xf32>, vector<16x512xf32>, vector<4x512xf32> -> vector<4x512xf32>
    %cst_27 = arith.constant 0.000000e+00 : f32
    %109 = vector.broadcast %cst_27 : f32 to vector<4x512xf32>
    %110 = arith.maximumf %108, %109 : vector<4x512xf32>
    %111 = arith.addf %90, %110 : vector<4x512xf32>
    %112 = vector.extract_strided_slice %1 {offsets = [20, 0], sizes = [4, 512], strides = [1, 1]} : vector<32x512xf32> to vector<4x512xf32>
    %113 = vector.shape_cast %112 : vector<4x512xf32> to vector<4x1x512xf32>
    %114 = vector.shape_cast %112 : vector<4x512xf32> to vector<1x4x512xf32>
    %115 = vector.broadcast %113 : vector<4x1x512xf32> to vector<4x4x512xf32>
    %116 = vector.broadcast %114 : vector<1x4x512xf32> to vector<4x4x512xf32>
    %117 = arith.mulf %115, %116 : vector<4x4x512xf32>
    %118 = vector.shape_cast %117 : vector<4x4x512xf32> to vector<16x512xf32>
    %cst_28 = arith.constant dense<0.000000e+00> : vector<4x512xf32>
    %119 = tpu.matmul %3, %118, %cst_28 {dimension_numbers = #tpu.dot_dimension_numbers<[1], [0], [0], [1], [0, 0, 1, 1], [], []>} : vector<4x16xf32>, vector<16x512xf32>, vector<4x512xf32> -> vector<4x512xf32>
    %cst_29 = arith.constant 0.000000e+00 : f32
    %120 = vector.broadcast %cst_29 : f32 to vector<4x512xf32>
    %121 = arith.maximumf %119, %120 : vector<4x512xf32>
    %122 = arith.addf %101, %121 : vector<4x512xf32>
    %123 = vector.shape_cast %112 : vector<4x512xf32> to vector<4x1x512xf32>
    %124 = vector.shape_cast %121 : vector<4x512xf32> to vector<1x4x512xf32>
    %125 = vector.broadcast %123 : vector<4x1x512xf32> to vector<4x4x512xf32>
    %126 = vector.broadcast %124 : vector<1x4x512xf32> to vector<4x4x512xf32>
    %127 = arith.mulf %125, %126 : vector<4x4x512xf32>
    %128 = vector.shape_cast %127 : vector<4x4x512xf32> to vector<16x512xf32>
    %cst_30 = arith.constant dense<0.000000e+00> : vector<4x512xf32>
    %129 = tpu.matmul %4, %128, %cst_30 {dimension_numbers = #tpu.dot_dimension_numbers<[1], [0], [0], [1], [0, 0, 1, 1], [], []>} : vector<4x16xf32>, vector<16x512xf32>, vector<4x512xf32> -> vector<4x512xf32>
    %cst_31 = arith.constant 0.000000e+00 : f32
    %130 = vector.broadcast %cst_31 : f32 to vector<4x512xf32>
    %131 = arith.maximumf %129, %130 : vector<4x512xf32>
    %132 = arith.addf %111, %131 : vector<4x512xf32>
    %133 = vector.extract_strided_slice %1 {offsets = [24, 0], sizes = [4, 512], strides = [1, 1]} : vector<32x512xf32> to vector<4x512xf32>
    %134 = vector.shape_cast %133 : vector<4x512xf32> to vector<4x1x512xf32>
    %135 = vector.shape_cast %133 : vector<4x512xf32> to vector<1x4x512xf32>
    %136 = vector.broadcast %134 : vector<4x1x512xf32> to vector<4x4x512xf32>
    %137 = vector.broadcast %135 : vector<1x4x512xf32> to vector<4x4x512xf32>
    %138 = arith.mulf %136, %137 : vector<4x4x512xf32>
    %139 = vector.shape_cast %138 : vector<4x4x512xf32> to vector<16x512xf32>
    %cst_32 = arith.constant dense<0.000000e+00> : vector<4x512xf32>
    %140 = tpu.matmul %3, %139, %cst_32 {dimension_numbers = #tpu.dot_dimension_numbers<[1], [0], [0], [1], [0, 0, 1, 1], [], []>} : vector<4x16xf32>, vector<16x512xf32>, vector<4x512xf32> -> vector<4x512xf32>
    %cst_33 = arith.constant 0.000000e+00 : f32
    %141 = vector.broadcast %cst_33 : f32 to vector<4x512xf32>
    %142 = arith.maximumf %140, %141 : vector<4x512xf32>
    %143 = arith.addf %122, %142 : vector<4x512xf32>
    %144 = vector.shape_cast %133 : vector<4x512xf32> to vector<4x1x512xf32>
    %145 = vector.shape_cast %142 : vector<4x512xf32> to vector<1x4x512xf32>
    %146 = vector.broadcast %144 : vector<4x1x512xf32> to vector<4x4x512xf32>
    %147 = vector.broadcast %145 : vector<1x4x512xf32> to vector<4x4x512xf32>
    %148 = arith.mulf %146, %147 : vector<4x4x512xf32>
    %149 = vector.shape_cast %148 : vector<4x4x512xf32> to vector<16x512xf32>
    %cst_34 = arith.constant dense<0.000000e+00> : vector<4x512xf32>
    %150 = tpu.matmul %4, %149, %cst_34 {dimension_numbers = #tpu.dot_dimension_numbers<[1], [0], [0], [1], [0, 0, 1, 1], [], []>} : vector<4x16xf32>, vector<16x512xf32>, vector<4x512xf32> -> vector<4x512xf32>
    %cst_35 = arith.constant 0.000000e+00 : f32
    %151 = vector.broadcast %cst_35 : f32 to vector<4x512xf32>
    %152 = arith.maximumf %150, %151 : vector<4x512xf32>
    %153 = arith.addf %132, %152 : vector<4x512xf32>
    %154 = vector.extract_strided_slice %1 {offsets = [28, 0], sizes = [4, 512], strides = [1, 1]} : vector<32x512xf32> to vector<4x512xf32>
    %155 = vector.shape_cast %154 : vector<4x512xf32> to vector<4x1x512xf32>
    %156 = vector.shape_cast %154 : vector<4x512xf32> to vector<1x4x512xf32>
    %157 = vector.broadcast %155 : vector<4x1x512xf32> to vector<4x4x512xf32>
    %158 = vector.broadcast %156 : vector<1x4x512xf32> to vector<4x4x512xf32>
    %159 = arith.mulf %157, %158 : vector<4x4x512xf32>
    %160 = vector.shape_cast %159 : vector<4x4x512xf32> to vector<16x512xf32>
    %cst_36 = arith.constant dense<0.000000e+00> : vector<4x512xf32>
    %161 = tpu.matmul %3, %160, %cst_36 {dimension_numbers = #tpu.dot_dimension_numbers<[1], [0], [0], [1], [0, 0, 1, 1], [], []>} : vector<4x16xf32>, vector<16x512xf32>, vector<4x512xf32> -> vector<4x512xf32>
    %cst_37 = arith.constant 0.000000e+00 : f32
    %162 = vector.broadcast %cst_37 : f32 to vector<4x512xf32>
    %163 = arith.maximumf %161, %162 : vector<4x512xf32>
    %164 = arith.addf %143, %163 : vector<4x512xf32>
    %165 = vector.shape_cast %154 : vector<4x512xf32> to vector<4x1x512xf32>
    %166 = vector.shape_cast %163 : vector<4x512xf32> to vector<1x4x512xf32>
    %167 = vector.broadcast %165 : vector<4x1x512xf32> to vector<4x4x512xf32>
    %168 = vector.broadcast %166 : vector<1x4x512xf32> to vector<4x4x512xf32>
    %169 = arith.mulf %167, %168 : vector<4x4x512xf32>
    %170 = vector.shape_cast %169 : vector<4x4x512xf32> to vector<16x512xf32>
    %cst_38 = arith.constant dense<0.000000e+00> : vector<4x512xf32>
    %171 = tpu.matmul %4, %170, %cst_38 {dimension_numbers = #tpu.dot_dimension_numbers<[1], [0], [0], [1], [0, 0, 1, 1], [], []>} : vector<4x16xf32>, vector<16x512xf32>, vector<4x512xf32> -> vector<4x512xf32>
    %cst_39 = arith.constant 0.000000e+00 : f32
    %172 = vector.broadcast %cst_39 : f32 to vector<4x512xf32>
    %173 = arith.maximumf %171, %172 : vector<4x512xf32>
    %174 = arith.addf %153, %173 : vector<4x512xf32>
    %175 = vector.extract_strided_slice %2 {offsets = [0, 0], sizes = [8, 1], strides = [1, 1]} : vector<105x1xf32> to vector<8x1xf32>
    %cst_40 = arith.constant 0.000000e+00 : f32
    %176 = vector.broadcast %cst_40 : f32 to vector<1x512xf32>
    %177 = vector.extract_strided_slice %175 {offsets = [0, 0], sizes = [4, 1], strides = [1, 1]} : vector<8x1xf32> to vector<4x1xf32>
    %178 = vector.broadcast %177 : vector<4x1xf32> to vector<4x512xf32>
    %179 = arith.mulf %164, %178 : vector<4x512xf32>
    %cst_41 = arith.constant dense<0.000000e+00> : vector<512xf32>
    %180 = vector.multi_reduction <add>, %179, %cst_41 [0] : vector<4x512xf32> to vector<512xf32>
    %181 = vector.shape_cast %180 : vector<512xf32> to vector<1x512xf32>
    %182 = arith.addf %176, %181 : vector<1x512xf32>
    %183 = vector.extract_strided_slice %175 {offsets = [4, 0], sizes = [4, 1], strides = [1, 1]} : vector<8x1xf32> to vector<4x1xf32>
    %184 = vector.broadcast %183 : vector<4x1xf32> to vector<4x512xf32>
    %185 = arith.mulf %174, %184 : vector<4x512xf32>
    %cst_42 = arith.constant dense<0.000000e+00> : vector<512xf32>
    %186 = vector.multi_reduction <add>, %185, %cst_42 [0] : vector<4x512xf32> to vector<512xf32>
    %187 = vector.shape_cast %186 : vector<512xf32> to vector<1x512xf32>
    %188 = arith.addf %182, %187 : vector<1x512xf32>
    %c0_43 = arith.constant 0 : index
    %c0_44 = arith.constant 0 : index
    %189 = vector.load %arg4[%c0_43, %c0_44] : memref<32x32xf32, #tpu.memory_space<vmem>>, vector<32x32xf32>
    %190 = vector.extract_strided_slice %2 {offsets = [8, 0], sizes = [32, 1], strides = [1, 1]} : vector<105x1xf32> to vector<32x1xf32>
    %cst_45 = arith.constant dense<0.000000e+00> : vector<32x512xf32>
    %191 = tpu.matmul %189, %1, %cst_45 {dimension_numbers = #tpu.dot_dimension_numbers<[1], [0], [0], [1], [0, 0, 1, 1], [], []>} : vector<32x32xf32>, vector<32x512xf32>, vector<32x512xf32> -> vector<32x512xf32>
    %192 = vector.broadcast %190 : vector<32x1xf32> to vector<32x512xf32>
    %193 = arith.addf %191, %192 : vector<32x512xf32>
    %cst_46 = arith.constant 0.000000e+00 : f32
    %194 = vector.broadcast %cst_46 : f32 to vector<32x512xf32>
    %195 = arith.maximumf %193, %194 : vector<32x512xf32>
    %c0_47 = arith.constant 0 : index
    %c0_48 = arith.constant 0 : index
    %196 = vector.load %arg5[%c0_47, %c0_48] : memref<32x32xf32, #tpu.memory_space<vmem>>, vector<32x32xf32>
    %197 = vector.extract_strided_slice %2 {offsets = [40, 0], sizes = [32, 1], strides = [1, 1]} : vector<105x1xf32> to vector<32x1xf32>
    %cst_49 = arith.constant dense<0.000000e+00> : vector<32x512xf32>
    %198 = tpu.matmul %196, %195, %cst_49 {dimension_numbers = #tpu.dot_dimension_numbers<[1], [0], [0], [1], [0, 0, 1, 1], [], []>} : vector<32x32xf32>, vector<32x512xf32>, vector<32x512xf32> -> vector<32x512xf32>
    %199 = vector.broadcast %197 : vector<32x1xf32> to vector<32x512xf32>
    %200 = arith.addf %198, %199 : vector<32x512xf32>
    %cst_50 = arith.constant 0.000000e+00 : f32
    %201 = vector.broadcast %cst_50 : f32 to vector<32x512xf32>
    %202 = arith.maximumf %200, %201 : vector<32x512xf32>
    %203 = vector.extract_strided_slice %2 {offsets = [72, 0], sizes = [32, 1], strides = [1, 1]} : vector<105x1xf32> to vector<32x1xf32>
    %204 = vector.extract_strided_slice %2 {offsets = [104, 0], sizes = [1, 1], strides = [1, 1]} : vector<105x1xf32> to vector<1x1xf32>
    %205 = vector.broadcast %203 : vector<32x1xf32> to vector<32x512xf32>
    %206 = arith.mulf %202, %205 : vector<32x512xf32>
    %cst_51 = arith.constant dense<0.000000e+00> : vector<512xf32>
    %207 = vector.multi_reduction <add>, %206, %cst_51 [0] : vector<32x512xf32> to vector<512xf32>
    %208 = vector.shape_cast %207 : vector<512xf32> to vector<1x512xf32>
    %209 = vector.broadcast %204 : vector<1x1xf32> to vector<1x512xf32>
    %210 = arith.addf %208, %209 : vector<1x512xf32>
    %211 = arith.addf %188, %210 : vector<1x512xf32>
    %c0_52 = arith.constant 0 : index
    %c0_53 = arith.constant 0 : index
    %212 = vector.load %arg7[%c0_52, %c0_53] : memref<1x512xf32, #tpu.memory_space<vmem>>, vector<1x512xf32>
    tpu.vector_store %arg7[%c0_52, %c0_53], %211 {strides = array<i32>} : memref<1x512xf32, #tpu.memory_space<vmem>>, vector<1x512xf32>,
    return
  }
  func.func @transform_0(%arg0: i32) -> (i32, i32) {
    %c0_i32 = arith.constant 0 : i32
    %c0_i32_0 = arith.constant 0 : i32
    return %c0_i32, %arg0 : i32, i32
  }
  func.func @transform_1(%arg0: i32) -> (i32, i32) {
    %c0_i32 = arith.constant 0 : i32
    %c0_i32_0 = arith.constant 0 : i32
    %c0_i32_1 = arith.constant 0 : i32
    return %c0_i32, %c0_i32_0 : i32, i32
  }
  func.func @transform_2(%arg0: i32) -> (i32, i32) {
    %c0_i32 = arith.constant 0 : i32
    %c0_i32_0 = arith.constant 0 : i32
    %c0_i32_1 = arith.constant 0 : i32
    return %c0_i32, %c0_i32_0 : i32, i32
  }
  func.func @transform_3(%arg0: i32) -> (i32, i32) {
    %c0_i32 = arith.constant 0 : i32
    %c0_i32_0 = arith.constant 0 : i32
    %c0_i32_1 = arith.constant 0 : i32
    return %c0_i32, %c0_i32_0 : i32, i32
  }
  func.func @transform_4(%arg0: i32) -> (i32, i32) {
    %c0_i32 = arith.constant 0 : i32
    %c0_i32_0 = arith.constant 0 : i32
    %c0_i32_1 = arith.constant 0 : i32
    return %c0_i32, %c0_i32_0 : i32, i32
  }
  func.func @transform_5(%arg0: i32) -> (i32, i32) {
    %c0_i32 = arith.constant 0 : i32
    %c0_i32_0 = arith.constant 0 : i32
    %c0_i32_1 = arith.constant 0 : i32
    return %c0_i32, %c0_i32_0 : i32, i32
  }
  func.func @transform_6(%arg0: i32) -> (i32, i32) {
    %c0_i32 = arith.constant 0 : i32
    %c0_i32_0 = arith.constant 0 : i32
    return %c0_i32, %arg0 : i32, i32
  }
}

</mosaic_0001>

<bundles_post_ra>
// kernel: xdeepfm_forward.2
= control target key start
LH: loop header
LB: loop body
LE: loop exit
PB: predicated region body
PF: predicated region fallthrough
CT: control target
= control target key end

     0   :  { %s5927_s26 = smov 0   ;;  %s7617_s0 = inlined_call_operand.vmem [shape: f32[4,16], index: 0, kind: input, shape index: {}]   ;;  %s7618_s1 = inlined_call_operand.vmem [shape: f32[4,16], index: 1, kind: input, shape index: {}]   ;;  %s7619_s2 = inlined_call_operand.vmem [shape: f32[32,32], index: 2, kind: input, shape index: {}]   ;;  %s7620_s3 = inlined_call_operand.vmem [shape: f32[32,32], index: 3, kind: input, shape index: {}]   ;;  %s7621_s4 = inlined_call_operand.vmem [shape: f32[105,1], index: 4, kind: input, shape index: {}]   ;;  %s7622_s5 = inlined_call_operand.vmem [shape: bf16[32,1000], index: 5, kind: input, shape index: {}]   ;;  %s7623_s6 = inlined_call_operand.<no memory space> [shape: bf16[], index: 6, kind: input, shape index: {}]   ;;  %s7624_s7 = inlined_call_operand.vmem [shape: f32[1,1024], index: 7, kind: output, shape index: {}]  }
   0x1   :  { %v12_v0 = vstv %s7623_s6 }
   0x2   :  { %v5925_v1 = vunpack.i.l.bf16 %v12_v0 }
   0x4   :  { %7731 = vst [vmem:[#allocation8_spill] sm:$0xff] %v5925_v1 }
   0x5 LB: > { %s5598_s27 = sadd.s32 4294967295, %s5877_s26   ;;  %p5602_p0 = scmp.ge.s32.totalorder %s5877_s26, 1  ;;  %s5877_s26 = sphi %s5927_s26, %s22_s26  }
   0x6   : > { %p227_p1 = scmp.lt.s32.totalorder %s5877_s26, 3 }
   0x8   : > { %p228_p2 = pnand %p5602_p0, %p227_p1 }
   0xa   : > { %231 = sbr.rel (%p228_p2) target bundleno = 2224 (0x8b0), region = 44 }
   0xb   : > { %v7732_v1 = vld [vmem:[#allocation8_spill] sm:$0xff] }
   0xf   : > { %s5603_s28 = sshll.u32 %s5598_s27, 2  ;;  %s5935_s29 = sshll.u32 %s5598_s27, 9  ;;  %v7625_v2 = vlaneseq  ;;  %v7626_v4 = vmov 0.0   ;;  %v5880_v48 = vmov 1966171168   ;;  %vm831_vm5 = vcmask 130048  }
  0x10   : > { %p265_p3 = scmp.lt.s32.totalorder %s5603_s28, 7  ;;  %v285_v3 = vstv %s5935_s29  ;;  %s5818_s6 = sadd.s32 128, %s5935_s29  ;;  %899 = vmatprep.mubr.f32.mxu0 %v7626_v4  ;;  %970 = vmatprep.mubr.f32.mxu1 %v7626_v4  ;;  %v664_v49 = vunpack.c.l.s4 %v5880_v48  ;;  %vm4992_vm6 = vcmask 261120   ;;  %vm4897_vm7 = vcmask 1043456  }
  0x11   : > { %v284_v5 = vand.u32 127, %v7625_v2  ;;  %v301_v6 = vstv %s5818_s6  ;;  %s5820_s30 = sadd.s32 256, %s5935_s29  ;;  %s328_s8 = sadd.s32 3, %s5603_s28  ;;  %v667_v0 = vshrl.u32 %v7625_v2, 7 }
  0x12   : > { %s7959_s28 = smov (!%p265_p3, %s5603_s28), 7  ;;  %v318_v7 = vstv %s5820_s30  ;;  %s5949_s9 = ssub.s32 7, %s328_s8  ;;  %v665_v63 = vunpack.c.0.s8 %v664_v49 }
  0x13   : > { %v5945_v8 = vadd.s32 %v285_v3, %v284_v5  ;;  %v5947_v9 = vadd.s32 %v301_v6, %v284_v5  ;;  %v319_v10 = vadd.s32 %v318_v7, %v284_v5  ;;  %s5604_s10 = sshll.u32 %s7959_s28, 2  ;;  %p330_p4 = scmp.lt.s32.totalorder %s5949_s9, 0  ;;  %v346_v35 = vstv %s5949_s9 }
  0x14   : > { %s5956_s13 = scalar_lea.vmem %s7622_s5, %s5604_s10  ;;  %s5822_s16 = sadd.s32 384, %s5935_s29  ;;  %vm5988_vm3 = vcmp.lt.s32.totalorder %v346_v35, 0 }
  0x15   : > { %7733 = vst [vmem:[#allocation9_spill] sm:$0xff] %v5945_v8  ;;  %7734 = vst [vmem:[#allocation10_spill] sm:$0xff] %v5947_v9  ;;  %vm287_vm0 = vcmp.lt.s32.totalorder %v5945_v8, 1000  ;;  %vm303_vm1 = vcmp.lt.s32.totalorder %v5947_v9, 1000  ;;  %v279_v11 = vld [vmem:[%s5956_s13] sm:$0xff]   ;;  %vm320_vm2 = vcmp.lt.s32.totalorder %v319_v10, 1000  ;;  %v353_v29 = vstv %s5822_s16 }
  0x16   : > { %v5610_v12 = vld [vmem:[%s5956_s13 + $0x8] sm:$0xf]  ;;  %s331_s14 = scalar_select %p330_p4, 0, 255  ;;  %v280_v13 = vunpack.c.l.bf16 %v279_v11  ;;  %v295_v14 = vunpack.c.h.bf16 %v279_v11  ;;  %v354_v36 = vadd.s32 %v353_v29, %v284_v5  ;;  %v6026_v5 = vsub.s32 %v665_v63, %v667_v0  ;;  %v6125_v63 = vld [vmem:[%s7617_s0] sm:$0xf] }
  0x17   : > { %v312_v15 = vunpack.c.l.bf16 %v5610_v12  ;;  %v5618_v16 = vld [vmem:[%s5956_s13 + $0x28] sm:$0xf] }
  0x18   : > { %v5626_v17 = vld [vmem:[%s5956_s13 + $0x48] sm:$0xf]  ;;  %s332_s15 = sshrl.u32 %s331_s14, 1  ;;  %v397_v19 = vunpack.c.l.bf16 %v5618_v16  ;;  %v288_v22 = vsel %vm287_vm0, %v280_v13, %v7732_v1  ;;  %v304_v23 = vsel %vm303_vm1, %v295_v14, %v7732_v1  ;;  %vm355_vm4 = vcmp.lt.s32.totalorder %v354_v36, 1000  ;;  %7739 = vst [vmem:[#allocation13_spill] sm:$0xff] %v6026_v5 }
  0x19   : > { %v5634_v18 = vld [vmem:[%s5956_s13 + $0x68] sm:$0xf]  ;;  %v482_v20 = vunpack.c.l.bf16 %v5626_v17  ;;  %v321_v24 = vsel %vm320_vm2, %v312_v15, %v7732_v1  ;;  %s333_s17 = sor.u32 %s332_s15, %s331_s14  ;;  %v289_v25 = vpack.c.bf16 %v7626_v4, %v288_v22  ;;  %v306_v26 = vpack.c.bf16 %v7626_v4, %v304_v23 }
  0x1a   : > { %v567_v21 = vunpack.c.l.bf16 %v5634_v18  ;;  %v323_v27 = vpack.c.bf16 %v7626_v4, %v321_v24  ;;  %s334_s18 = sand.u32 85, %s333_s17  ;;  %v406_v28 = vsel %vm320_vm2, %v397_v19, %v7732_v1  ;;  %v6038_v18 = vsub.s32 1, %v667_v0 }
  0x1b   : > { %s335_s19 = sshrl.u32 %s334_s18, 1  ;;  %v408_v30 = vpack.c.bf16 %v7626_v4, %v406_v28  ;;  %v491_v31 = vsel %vm320_vm2, %v482_v20, %v7732_v1  ;;  %292 = vst [vmem:[#allocation7] sm:$0xf] %v289_v25  ;;  %309 = vst [vmem:[#allocation7 + $0x4] sm:$0xf] %v306_v26  ;;  %v6040_v19 = vsub.s32 3, %v667_v0 }
  0x1c   : > { %v576_v32 = vsel %vm320_vm2, %v567_v21, %v7732_v1  ;;  %326 = vst [vmem:[#allocation7 + $0x8] sm:$0xf] %v323_v27  ;;  %s336_s20 = sor.u32 %s335_s19, %s334_s18  ;;  %v493_v33 = vpack.c.bf16 %v7626_v4, %v491_v31  ;;  %v6042_v20 = vsub.s32 0, %v667_v0  ;;  %v6044_v21 = vsub.s32 2, %v667_v0 }
  0x1d   : > { %v578_v34 = vpack.c.bf16 %v7626_v4, %v576_v32  ;;  %s337_s21 = sand.u32 51, %s336_s20  ;;  %411 = vst [vmem:[#allocation7 + $0x18] sm:$0xf] %v408_v30 }
  0x1e   : > { %s338_s22 = sshrl.u32 %s337_s21, 2  ;;  %496 = vst [vmem:[#allocation7 + $0x28] sm:$0xf] %v493_v33 }
  0x1f   : > { %581 = vst [vmem:[#allocation7 + $0x38] sm:$0xf] %v578_v34  ;;  %s339_s23 = sor.u32 %s338_s22, %s337_s21 }
  0x20   : > { %s340_s24 = sand.u32 15, %s339_s23 }
  0x21   : > { %v5612_v37 = vld [vmem:[%s5956_s13 + $0xc] sm:%s340_s24] }
  0x22   : > { %v5620_v39 = vld [vmem:[%s5956_s13 + $0x2c] sm:%s340_s24]  ;;  %v342_v40 = vunpack.c.l.bf16 %v5612_v37 }
  0x23   : > { %v427_v41 = vunpack.c.l.bf16 %v5620_v39  ;;  %v5628_v42 = vld [vmem:[%s5956_s13 + $0x4c] sm:%s340_s24] }
  0x24   : > { %v5636_v43 = vld [vmem:[%s5956_s13 + $0x6c] sm:%s340_s24]  ;;  %v512_v44 = vunpack.c.l.bf16 %v5628_v42  ;;  %v348_v46 = vsel %vm5988_vm3, %v7732_v1, %v342_v40 }
  0x25   : > { %v597_v45 = vunpack.c.l.bf16 %v5636_v43  ;;  %v433_v47 = vsel %vm5988_vm3, %v7732_v1, %v427_v41  ;;  %v356_v50 = vsel %vm355_vm4, %v348_v46, %v7732_v1  ;;  %v617_v60 = vld [vmem:[#allocation7] sm:$0xff] }
  0x26   : > { %v441_v51 = vsel %vm355_vm4, %v433_v47, %v7732_v1  ;;  %v518_v52 = vsel %vm5988_vm3, %v7732_v1, %v512_v44  ;;  %v358_v54 = vpack.c.bf16 %v7626_v4, %v356_v50  ;;  %v6019_v61 = vunpack.c.l.bf16 %v617_v60 }
  0x27   : > { %v603_v53 = vsel %vm5988_vm3, %v7732_v1, %v597_v45  ;;  %v443_v55 = vpack.c.bf16 %v7626_v4, %v441_v51  ;;  %v526_v56 = vsel %vm355_vm4, %v518_v52, %v7732_v1  ;;  %v6021_v62 = vunpack.c.h.bf16 %v617_v60 }
  0x28   : > { %v611_v57 = vsel %vm355_vm4, %v603_v53, %v7732_v1  ;;  %v528_v58 = vpack.c.bf16 %v7626_v4, %v526_v56  ;;  %361 = vst [vmem:[#allocation7 + $0xc] sm:$0xf] %v358_v54  ;;  %7737 = vst [vmem:[#allocation11_spill] sm:$0xff] %v6019_v61 }
  0x29   : > { %v613_v59 = vpack.c.bf16 %v7626_v4, %v611_v57  ;;  %446 = vst [vmem:[#allocation7 + $0x1c] sm:$0xf] %v443_v55  ;;  %7738 = vst [vmem:[#allocation12_spill] sm:$0xff] %v6021_v62  ;;  %v661_v3 = vcombine.low %v6019_v61, %v6021_v62 }
  0x2a   : > { %531 = vst [vmem:[#allocation7 + $0x2c] sm:$0xf] %v528_v58 }
  0x2b   : > { %616 = vst [vmem:[#allocation7 + $0x3c] sm:$0xf] %v613_v59  ;;  %v669_v12 = vrot.slane %v661_v3, %v6026_v5 }
  0x2f   : > { %v618_v6 = vld [vmem:[#allocation7 + $0x8] sm:$0xff] }
  0x30   : > { %v6028_v7 = vunpack.c.l.bf16 %v618_v6  ;;  %v6030_v10 = vunpack.c.h.bf16 %v618_v6 }
  0x32   : > { %7740 = vst [vmem:[#allocation14_spill] sm:$0xff] %v6028_v7  ;;  %7741 = vst [vmem:[#allocation15_spill] sm:$0xff] %v6030_v10  ;;  %v662_v11 = vcombine.low %v6028_v7, %v6030_v10 }
  0x34   : > { %v676_v13 = vrot.slane %v662_v11, %v6026_v5  ;;  %v1194_v11 = vcombine.high %v6019_v61, %v6021_v62 }
  0x36   : > { %v677_v14 = vcombine.low %v669_v12, %v676_v13  ;;  %v678_v15 = vcombine.high %v669_v12, %v676_v13  ;;  %v1195_v12 = vcombine.high %v6028_v7, %v6030_v10  ;;  %v1202_v13 = vrot.slane %v1194_v11, %v6026_v5 }
  0x38   : > { %v685_v16 = vrot.slane %v677_v14, %v6026_v5  ;;  %v692_v17 = vrot.slane %v678_v15, %v6026_v5  ;;  %v1209_v14 = vrot.slane %v1195_v12, %v6026_v5 }
  0x3a   : > { %v693_v22 = vcombine.high %v685_v16, %v685_v16  ;;  %v694_v23 = vcombine.high %v692_v17, %v692_v17  ;;  %v6047_v24 = vrot.slane %v685_v16, %v6038_v18  ;;  %v6050_v25 = vrot.slane %v692_v17, %v6038_v18 }
  0x3b   : > { %v6053_v26 = vrot.slane %v685_v16, %v6040_v19  ;;  %v6056_v27 = vrot.slane %v692_v17, %v6040_v19  ;;  %v6059_v28 = vrot.slane %v685_v16, %v6042_v20  ;;  %v6062_v29 = vrot.slane %v692_v17, %v6042_v20 }
  0x3c   : > { %v6065_v30 = vrot.slane %v693_v22, %v6038_v18  ;;  %v6068_v31 = vrot.slane %v694_v23, %v6038_v18  ;;  %v6071_v32 = vrot.slane %v693_v22, %v6040_v19  ;;  %v6074_v33 = vrot.slane %v694_v23, %v6040_v19 }
  0x3d   : > { %v6077_v34 = vrot.slane %v693_v22, %v6042_v20  ;;  %v6080_v35 = vrot.slane %v694_v23, %v6042_v20  ;;  %v6083_v36 = vrot.slane %v693_v22, %v6044_v21  ;;  %v6086_v37 = vrot.slane %v694_v23, %v6044_v21 }
  0x3e   : > { %v784_v38 = vmul.f32 %v6065_v30, %v6021_v62  ;;  %v788_v39 = vmul.f32 %v6068_v31, %v6021_v62  ;;  %v786_v40 = vmul.f32 %v6071_v32, %v6030_v10  ;;  %v790_v41 = vmul.f32 %v6074_v33, %v6030_v10 }
  0x3f   : > { %v783_v42 = vmul.f32 %v6077_v34, %v6019_v61  ;;  %v787_v43 = vmul.f32 %v6080_v35, %v6019_v61  ;;  %v785_v44 = vmul.f32 %v6083_v36, %v6028_v7  ;;  %v789_v45 = vmul.f32 %v6086_v37, %v6028_v7 }
  0x40   : > { %v5643_v46 = vcombine.low %v784_v38, %v788_v39  ;;  %v5645_v47 = vcombine.low %v786_v40, %v790_v41  ;;  %v776_v48 = vmul.f32 %v6047_v24, %v6021_v62  ;;  %v780_v49 = vmul.f32 %v6050_v25, %v6021_v62 }
  0x41   : > { %v5642_v50 = vcombine.low %v783_v42, %v787_v43  ;;  %v5644_v51 = vcombine.low %v785_v44, %v789_v45  ;;  %v778_v52 = vmul.f32 %v6053_v26, %v6030_v10  ;;  %v782_v53 = vmul.f32 %v6056_v27, %v6030_v10 }
  0x42   : > { %863 = vmatprep.subr.mxu0 %v5643_v46  ;;  %934 = vmatprep.subr.mxu1 %v5645_v47  ;;  %v5639_v54 = vcombine.low %v776_v48, %v780_v49  ;;  %v775_v55 = vmul.f32 %v6059_v28, %v6019_v61  ;;  %v779_v56 = vmul.f32 %v6062_v29, %v6019_v61 }
  0x43   : > { %864 = vmatpush1.msra.mxu0 %v5642_v50  ;;  %935 = vmatpush1.msra.mxu1 %v5644_v51  ;;  %v5641_v57 = vcombine.low %v778_v52, %v782_v53  ;;  %v6117_v58 = vrot.slane %v685_v16, %v6044_v21  ;;  %v6120_v59 = vrot.slane %v692_v17, %v6044_v21 }
  0x44   : > { %865 = vmatprep.subr.mxu0 %v5639_v54  ;;  %v5638_v60 = vcombine.low %v775_v55, %v779_v56  ;;  %v1210_v15 = vcombine.low %v1202_v13, %v1209_v14  ;;  %v1211_v16 = vcombine.high %v1202_v13, %v1209_v14 }
  0x45   : > { %936 = vmatprep.subr.mxu1 %v5641_v57  ;;  %v777_v0 = vmul.f32 %v6117_v58, %v6028_v7  ;;  %v781_v3 = vmul.f32 %v6120_v59, %v6028_v7 }
  0x46   : > { %866 = vmatpush1.msra.mxu0 %v5638_v60  ;;  %v1218_v17 = vrot.slane %v1210_v15, %v6026_v5  ;;  %v1225_v22 = vrot.slane %v1211_v16, %v6026_v5 }
  0x47   : > { %v5640_v6 = vcombine.low %v777_v0, %v781_v3  ;;  %5646 = vmatmul.mubr.msk.f32.vlgmr.msra.gmra.mxu0 %vm831_vm5, %v6125_v63 }
  0x48   : > { %1108 = vmatprep.mubr.f32.mxu0 %v7626_v4  ;;  %v1226_v23 = vcombine.high %v1218_v17, %v1218_v17  ;;  %v1227_v38 = vcombine.high %v1225_v22, %v1225_v22  ;;  %v6178_v49 = vrot.slane %v1218_v17, %v6038_v18  ;;  %v6181_v50 = vrot.slane %v1225_v22, %v6038_v18 }
  0x49   : > { %937 = vmatpush1.msra.mxu1 %v5640_v6  ;;  %v6184_v51 = vrot.slane %v1218_v17, %v6040_v19  ;;  %v6195_v55 = vrot.slane %v1225_v22, %v6040_v19 }
  0x4a   : > { %5647 = vmatmul.mubr.msk.f32.vlgmr.msra.gmra.mxu1 %vm831_vm5, %v6125_v63  ;;  %v6146_v39 = vrot.slane %v1226_v23, %v6038_v18  ;;  %v6149_v40 = vrot.slane %v1227_v38, %v6038_v18  ;;  %v6152_v41 = vrot.slane %v1226_v23, %v6040_v19  ;;  %v6155_v42 = vrot.slane %v1227_v38, %v6040_v19 }
  0x4b   : > { %1179 = vmatprep.mubr.f32.mxu1 %v7626_v4  ;;  %v6158_v43 = vrot.slane %v1226_v23, %v6042_v20  ;;  %v6161_v44 = vrot.slane %v1227_v38, %v6042_v20  ;;  %v6164_v45 = vrot.slane %v1226_v23, %v6044_v21  ;;  %v6167_v46 = vrot.slane %v1227_v38, %v6044_v21 }
  0x4c   : > { %v6171_v47 = vmul.f32 %v6146_v39, %v6021_v62  ;;  %v6175_v48 = vmul.f32 %v6149_v40, %v6021_v62  ;;  %7742 = vst [vmem:[#allocation16_spill] sm:$0xff] %v6184_v51  ;;  %v6188_v53 = vmul.f32 %v6152_v41, %v6030_v10  ;;  %v6192_v54 = vmul.f32 %v6155_v42, %v6030_v10 }
  0x4d   : > { %7743 = vst [vmem:[#allocation17_spill] sm:$0xff] %v6195_v55  ;;  %v6201_v57 = vmul.f32 %v6158_v43, %v6019_v61  ;;  %v6205_v60 = vmul.f32 %v6161_v44, %v6019_v61  ;;  %v6209_v0 = vmul.f32 %v6164_v45, %v6028_v7  ;;  %v6215_v11 = vmul.f32 %v6167_v46, %v6028_v7 }
  0x4e   : > { %v5663_v6 = vcombine.high %v6171_v47, %v6175_v48  ;;  %v6219_v12 = vmul.f32 %v6178_v49, %v6021_v62  ;;  %v1313_v13 = vmul.f32 %v6181_v50, %v6021_v62  ;;  %v1311_v16 = vmul.f32 %v6184_v51, %v6030_v10 }
  0x4f   : > { %v6228_v23 = vrot.slane %v1218_v17, %v6042_v20  ;;  %v6231_v38 = vrot.slane %v1225_v22, %v6042_v20  ;;  %v6248_v51 = vrot.slane %v1218_v17, %v6044_v21  ;;  %v6263_v17 = vrot.slane %v1225_v22, %v6044_v21 }
 0x107   : > { %v901_v52 = vpop.f32.mrf.mxu0 }
 0x108   : > { %v6197_v56 = vmax.f32 %v901_v52, 0.0 }
 0x109   : > { %v903_v3 = vpop.f32.mrf.mxu0 }
 0x10a   : > { %v972_v14 = vpop.f32.mrf.mxu1  ;;  %v6223_v15 = vmax.f32 %v903_v3, 0.0  ;;  %v993_v48 = vmul.f32 %v6197_v56, %v6077_v34  ;;  %v997_v52 = vmul.f32 %v6197_v56, %v6080_v35  ;;  %v1315_v3 = vmul.f32 %v6195_v55, %v6030_v10 }
 0x10b   : > { %v6233_v47 = vmax.f32 %v972_v14, 0.0  ;;  %v985_v10 = vmul.f32 %v6197_v56, %v6059_v28 }
 0x10c   : > { %v974_v2 = vpop.f32.mrf.mxu1  ;;  %v994_v4 = vmul.f32 %v6223_v15, %v6065_v30  ;;  %v998_v62 = vmul.f32 %v6223_v15, %v6068_v31  ;;  %v986_v14 = vmul.f32 %v6223_v15, %v6047_v24  ;;  %v990_v35 = vmul.f32 %v6223_v15, %v6050_v25 }
 0x10d   : > { %v6250_v34 = vmax.f32 %v974_v2, 0.0  ;;  %v989_v30 = vmul.f32 %v6197_v56, %v6062_v29  ;;  %v995_v31 = vmul.f32 %v6233_v47, %v6083_v36  ;;  %v999_v24 = vmul.f32 %v6233_v47, %v6086_v37 }
 0x10e   : > { %v5653_v55 = vcombine.low %v994_v4, %v998_v62  ;;  %v5652_v28 = vcombine.low %v993_v48, %v997_v52  ;;  %v987_v29 = vmul.f32 %v6233_v47, %v6117_v58  ;;  %v5649_v4 = vcombine.low %v986_v14, %v990_v35 }
 0x10f   : > { %v996_v2 = vmul.f32 %v6250_v34, %v6071_v32  ;;  %v1000_v25 = vmul.f32 %v6250_v34, %v6074_v33  ;;  %v988_v62 = vmul.f32 %v6250_v34, %v6053_v26  ;;  %v992_v36 = vmul.f32 %v6250_v34, %v6056_v27  ;;  %v6280_v33 = vld [vmem:[%s7618_s1] sm:$0xf] }
 0x110   : > { %1072 = vmatprep.subr.mxu0 %v5653_v55  ;;  %v991_v37 = vmul.f32 %v6233_v47, %v6120_v59  ;;  %v5648_v32 = vcombine.low %v985_v10, %v989_v30  ;;  %v1308_v58 = vmul.f32 %v6228_v23, %v6019_v61  ;;  %v1312_v26 = vmul.f32 %v6231_v38, %v6019_v61 }
 0x111   : > { %v5655_v22 = vcombine.low %v996_v2, %v1000_v25  ;;  %1073 = vmatpush1.msra.mxu0 %v5652_v28  ;;  %v5654_v55 = vcombine.low %v995_v31, %v999_v24  ;;  %v5662_v27 = vcombine.high %v6201_v57, %v6205_v60  ;;  %v1310_v59 = vmul.f32 %v6248_v51, %v6028_v7  ;;  %v620_v24 = vld [vmem:[#allocation7 + $0x18] sm:$0xff] }
 0x112   : > { %1074 = vmatprep.subr.mxu0 %v5649_v4  ;;  %v1314_v10 = vmul.f32 %v6263_v17, %v6028_v7  ;;  %v5651_v48 = vcombine.low %v988_v62, %v992_v36  ;;  %v5665_v52 = vcombine.high %v6188_v53, %v6192_v54  ;;  %v5650_v14 = vcombine.low %v987_v29, %v991_v37  ;;  %v5614_v54 = vld [vmem:[%s5956_s13 + $0x20] sm:$0xff]  }
 0x113   : > { %1143 = vmatprep.subr.mxu1 %v5655_v22  ;;  %1075 = vmatpush1.msra.mxu0 %v5648_v32  ;;  %v5664_v57 = vcombine.high %v6209_v0, %v6215_v11  ;;  %v5659_v60 = vcombine.high %v6219_v12, %v1313_v13  ;;  %v5661_v35 = vcombine.high %v1311_v16, %v1315_v3  ;;  %v7744_v53 = vmov 0.0  }
 0x114   : > { %1144 = vmatpush1.msra.mxu1 %v5654_v55  ;;  %5656 = vmatmul.mubr.msk.f32.vlgmr.msra.gmra.mxu0 %vm831_vm5, %v6280_v33  ;;  %v5658_v30 = vcombine.high %v1308_v58, %v1312_v26  ;;  %v5660_v31 = vcombine.high %v1310_v59, %v1314_v10  ;;  %v364_v0 = vunpack.c.l.bf16 %v5614_v54  ;;  %v6322_v28 = vunpack.c.l.bf16 %v620_v24 }
 0x115   : > { %1145 = vmatprep.subr.mxu1 %v5651_v48  ;;  %1392 = vmatprep.subr.mxu0 %v5663_v6  ;;  %v380_v6 = vunpack.c.h.bf16 %v5614_v54  ;;  %v6324_v29 = vunpack.c.h.bf16 %v620_v24 }
 0x116   : > { %1146 = vmatpush1.msra.mxu1 %v5650_v14  ;;  %1393 = vmatpush1.msra.mxu0 %v5662_v27  ;;  %v372_v11 = vsel %vm287_vm0, %v364_v0, %v7732_v1  ;;  %7747 = vst [vmem:[#allocation20_spill] sm:$0xff] %v6322_v28 }
 0x117   : > { %5657 = vmatmul.mubr.msk.f32.vlgmr.msra.gmra.mxu1 %vm831_vm5, %v6280_v33  ;;  %1463 = vmatprep.subr.mxu1 %v5665_v52  ;;  %v389_v12 = vsel %vm303_vm1, %v380_v6, %v7732_v1  ;;  %v374_v13 = vpack.c.bf16 %v7744_v53, %v372_v11  ;;  %7748 = vst [vmem:[#allocation21_spill] sm:$0xff] %v6324_v29 }
 0x118   : > { %1464 = vmatpush1.msra.mxu1 %v5664_v57  ;;  %1394 = vmatprep.subr.mxu0 %v5659_v60  ;;  %v391_v16 = vpack.c.bf16 %v7744_v53, %v389_v12  ;;  %v1725_v62 = vcombine.low %v6322_v28, %v6324_v29 }
 0x119   : > { %1465 = vmatprep.subr.mxu1 %v5661_v35  ;;  %1395 = vmatpush1.msra.mxu0 %v5658_v30  ;;  %377 = vst [vmem:[#allocation7 + $0x10] sm:$0xf] %v374_v13 }
 0x11a   : > { %1428 = vmatprep.mubr.f32.mxu0 %v7744_v53  ;;  %1466 = vmatpush1.msra.mxu1 %v5660_v31  ;;  %394 = vst [vmem:[#allocation7 + $0x14] sm:$0xf] %v391_v16  ;;  %v1739_v37 = vrot.slane %v1725_v62, %v6026_v5 }
 0x11b   : > { %1499 = vmatprep.mubr.f32.mxu1 %v7744_v53  ;;  %5666 = vmatmul.mubr.msk.f32.vlgmr.msra.gmra.mxu0 %vm831_vm5, %v6125_v63 }
 0x11c   : > { %5667 = vmatmul.mubr.msk.f32.vlgmr.msra.gmra.mxu1 %vm831_vm5, %v6125_v63  ;;  %1634 = vmatprep.mubr.f32.mxu0 %v7744_v53 }
 0x11d   : > { %1705 = vmatprep.mubr.f32.mxu1 %v7744_v53 }
 0x121   : > { %v619_v3 = vld [vmem:[#allocation7 + $0x10] sm:$0xff] }
 0x122   : > { %v6318_v2 = vunpack.c.l.bf16 %v619_v3  ;;  %v6320_v25 = vunpack.c.h.bf16 %v619_v3 }
 0x124   : > { %7745 = vst [vmem:[#allocation18_spill] sm:$0xff] %v6318_v2  ;;  %7746 = vst [vmem:[#allocation19_spill] sm:$0xff] %v6320_v25  ;;  %v1724_v4 = vcombine.low %v6318_v2, %v6320_v25 }
 0x126   : > { %v1732_v36 = vrot.slane %v1724_v4, %v6026_v5 }
 0x128   : > { %v1740_v22 = vcombine.low %v1732_v36, %v1739_v37  ;;  %v1741_v32 = vcombine.high %v1732_v36, %v1739_v37 }
 0x12a   : > { %v1748_v58 = vrot.slane %v1740_v22, %v6026_v5  ;;  %v1755_v26 = vrot.slane %v1741_v32, %v6026_v5 }
 0x12c   : > { %v1756_v55 = vcombine.high %v1748_v58, %v1748_v58  ;;  %v1757_v27 = vcombine.high %v1755_v26, %v1755_v26  ;;  %v6373_v11 = vrot.slane %v1748_v58, %v6038_v18  ;;  %v6378_v13 = vrot.slane %v1755_v26, %v6038_v18 }
 0x12d   : > { %v6381_v16 = vrot.slane %v1748_v58, %v6040_v19  ;;  %v6396_v62 = vrot.slane %v1755_v26, %v6040_v19  ;;  %v6407_v32 = vrot.slane %v1748_v58, %v6042_v20 }
 0x12e   : > { %v6337_v10 = vrot.slane %v1756_v55, %v6038_v18  ;;  %v6340_v48 = vrot.slane %v1757_v27, %v6038_v18  ;;  %v6343_v52 = vrot.slane %v1756_v55, %v6040_v19  ;;  %v6346_v14 = vrot.slane %v1757_v27, %v6040_v19  ;;  %7757 = vst [vmem:[#allocation30_spill] sm:$0xff] %v6373_v11 }
 0x12f   : > { %v6349_v57 = vrot.slane %v1756_v55, %v6042_v20  ;;  %v6356_v30 = vrot.slane %v1757_v27, %v6042_v20  ;;  %v6359_v31 = vrot.slane %v1756_v55, %v6044_v21  ;;  %v6370_v6 = vrot.slane %v1757_v27, %v6044_v21  ;;  %7758 = vst [vmem:[#allocation31_spill] sm:$0xff] %v6378_v13 }
 0x130   : > { %7749 = vst [vmem:[#allocation22_spill] sm:$0xff] %v6337_v10  ;;  %7750 = vst [vmem:[#allocation23_spill] sm:$0xff] %v6340_v48  ;;  %v6363_v54 = vmul.f32 %v6337_v10, %v6320_v25  ;;  %v6367_v0 = vmul.f32 %v6340_v48, %v6320_v25  ;;  %v6385_v3 = vmul.f32 %v6343_v52, %v6324_v29 }
 0x131   : > { %7751 = vst [vmem:[#allocation24_spill] sm:$0xff] %v6343_v52  ;;  %7752 = vst [vmem:[#allocation25_spill] sm:$0xff] %v6346_v14  ;;  %v6389_v24 = vmul.f32 %v6346_v14, %v6324_v29  ;;  %v6393_v4 = vmul.f32 %v6349_v57, %v6318_v2  ;;  %v6400_v37 = vmul.f32 %v6356_v30, %v6318_v2 }
 0x132   : > { %7753 = vst [vmem:[#allocation26_spill] sm:$0xff] %v6349_v57  ;;  %7754 = vst [vmem:[#allocation27_spill] sm:$0xff] %v6356_v30  ;;  %v6404_v22 = vmul.f32 %v6359_v31, %v6322_v28  ;;  %v6410_v55 = vrot.slane %v1755_v26, %v6042_v20  ;;  %v5683_v61 = vcombine.low %v6363_v54, %v6367_v0  ;;  %v7764_v57 = vld [vmem:[#allocation17_spill] sm:$0xff] }
 0x133   : > { %7755 = vst [vmem:[#allocation28_spill] sm:$0xff] %v6359_v31  ;;  %7756 = vst [vmem:[#allocation29_spill] sm:$0xff] %v6370_v6  ;;  %v1852_v9 = vmul.f32 %v6370_v6, %v6322_v28  ;;  %v1839_v8 = vmul.f32 %v6373_v11, %v6320_v25  ;;  %v1843_v52 = vmul.f32 %v6378_v13, %v6320_v25  ;;  %v7763_v31 = vld [vmem:[#allocation16_spill] sm:$0xff] }
 0x134   : > { %7759 = vst [vmem:[#allocation32_spill] sm:$0xff] %v6381_v16  ;;  %7760 = vst [vmem:[#allocation33_spill] sm:$0xff] %v6396_v62  ;;  %v6427_v48 = vrot.slane %v1748_v58, %v6044_v21  ;;  %v1845_v11 = vmul.f32 %v6396_v62, %v6324_v29  ;;  %v1842_v58 = vmul.f32 %v6410_v55, %v6318_v2 }
 0x135   : > { %7761 = vst [vmem:[#allocation34_spill] sm:$0xff] %v6407_v32  ;;  %7762 = vst [vmem:[#allocation35_spill] sm:$0xff] %v6410_v55 }
 0x136   : > { %v1840_v13 = vmul.f32 %v6427_v48, %v6322_v28 }
 0x1d4   : > { %v6334_v59 = vpop.f32.mrf.mxu0 }
 0x1d6   : > { %v6353_v35 = vpop.f32.mrf.mxu0 }
 0x1d7   : > { %v6351_v60 = vpop.f32.mrf.mxu1 }
 0x1d9   : > { %v6375_v12 = vpop.f32.mrf.mxu1 }
 0x1db   : > { %v1430_v36 = vpop.f32.mrf.mxu0 }
 0x1dc   : > { %v6412_v27 = vmax.f32 %v1430_v36, 0.0  ;;  %v1501_v7 = vpop.f32.mrf.mxu1  ;;  %v1841_v36 = vmul.f32 %v6381_v16, %v6324_v29  ;;  %v1838_v16 = vmul.f32 %v6407_v32, %v6318_v2 }
 0x1dd   : > { %v6420_v1 = vmax.f32 %v1501_v7, 0.0  ;;  %v1432_v14 = vpop.f32.mrf.mxu0 }
 0x1de   : > { %v6429_v10 = vmax.f32 %v1432_v14, 0.0  ;;  %v1503_v54 = vpop.f32.mrf.mxu1  ;;  %v1522_v0 = vmul.f32 %v6412_v27, %v6158_v43  ;;  %v1526_v7 = vmul.f32 %v6412_v27, %v6161_v44  ;;  %v6444_v14 = vrot.slane %v1755_v26, %v6044_v21 }
 0x1df   : > { %v6437_v6 = vmax.f32 %v1503_v54, 0.0  ;;  %v1524_v62 = vmul.f32 %v6420_v1, %v6164_v45  ;;  %v1528_v54 = vmul.f32 %v6420_v1, %v6167_v46 }
 0x1e0   : > { %v1523_v43 = vmul.f32 %v6429_v10, %v6146_v39  ;;  %v1527_v44 = vmul.f32 %v6429_v10, %v6149_v40  ;;  %v5672_v26 = vcombine.low %v1522_v0, %v1526_v7  ;;  %v1515_v40 = vmul.f32 %v6429_v10, %v6178_v49 }
 0x1e1   : > { %v1525_v32 = vmul.f32 %v6437_v6, %v6152_v41  ;;  %v1529_v55 = vmul.f32 %v6437_v6, %v6155_v42  ;;  %v1519_v45 = vmul.f32 %v6429_v10, %v6181_v50  ;;  %v1517_v46 = vmul.f32 %v6437_v6, %v7763_v31 }
 0x1e2   : > { %v5673_v39 = vcombine.low %v1523_v43, %v1527_v44  ;;  %v1521_v41 = vmul.f32 %v6437_v6, %v7764_v57  ;;  %v1514_v42 = vmul.f32 %v6412_v27, %v6228_v23  ;;  %v1518_v0 = vmul.f32 %v6412_v27, %v6231_v38 }
 0x1e3   : > { %v5675_v30 = vcombine.low %v1525_v32, %v1529_v55  ;;  %v5674_v7 = vcombine.low %v1524_v62, %v1528_v54  ;;  %v5669_v43 = vcombine.low %v1515_v40, %v1519_v45  ;;  %v1516_v49 = vmul.f32 %v6420_v1, %v6248_v51 }
 0x1e4   : > { %1598 = vmatprep.subr.mxu0 %v5673_v39  ;;  %v1520_v50 = vmul.f32 %v6420_v1, %v6263_v17  ;;  %v5671_v31 = vcombine.low %v1517_v46, %v1521_v41  ;;  %v5668_v32 = vcombine.low %v1514_v42, %v1518_v0  ;;  %v1844_v57 = vmul.f32 %v6444_v14, %v6322_v28 }
 0x1e5   : > { %1669 = vmatprep.subr.mxu1 %v5675_v30  ;;  %1599 = vmatpush1.msra.mxu0 %v5672_v26  ;;  %v5685_v38 = vcombine.low %v6385_v3, %v6389_v24  ;;  %v5682_v62 = vcombine.low %v6393_v4, %v6400_v37  ;;  %v5684_v51 = vcombine.low %v6404_v22, %v1852_v9  ;;  %v1186_v22 = vmax.f32 %v6334_v59, 0.0 }
 0x1e6   : > { %1670 = vmatpush1.msra.mxu1 %v5674_v7  ;;  %1600 = vmatprep.subr.mxu0 %v5669_v43  ;;  %v5670_v23 = vcombine.low %v1516_v49, %v1520_v50  ;;  %v5679_v17 = vcombine.low %v1839_v8, %v1843_v52  ;;  %v5681_v30 = vcombine.low %v1841_v36, %v1845_v11  ;;  %v1188_v26 = vmax.f32 %v6351_v60, 0.0 }
 0x1e7   : > { %1671 = vmatprep.subr.mxu1 %v5671_v31  ;;  %1601 = vmatpush1.msra.mxu0 %v5668_v32  ;;  %v5678_v55 = vcombine.low %v1838_v16, %v1842_v58  ;;  %v5680_v44 = vcombine.low %v1840_v13, %v1844_v57  ;;  %v2250_v8 = vcombine.high %v6318_v2, %v6320_v25  ;;  %v1187_v39 = vmax.f32 %v6353_v35, 0.0 }
 0x1e8   : > { %1672 = vmatpush1.msra.mxu1 %v5670_v23  ;;  %5676 = vmatmul.mubr.msk.f32.vlgmr.msra.gmra.mxu0 %vm831_vm5, %v6280_v33  ;;  %v2251_v9 = vcombine.high %v6322_v28, %v6324_v29  ;;  %v1189_v40 = vmax.f32 %v6375_v12, 0.0  ;;  %v1510_v59 = vadd.f32 %v6412_v27, %v6197_v56  ;;  %v1512_v46 = vadd.f32 %v6420_v1, %v6233_v47 }
 0x1e9   : > { %5677 = vmatmul.mubr.msk.f32.vlgmr.msra.gmra.mxu1 %vm831_vm5, %v6280_v33  ;;  %1922 = vmatprep.subr.mxu0 %v5683_v61  ;;  %v2258_v61 = vrot.slane %v2250_v8, %v6026_v5  ;;  %v1511_v41 = vadd.f32 %v6429_v10, %v6223_v15  ;;  %v1513_v42 = vadd.f32 %v6437_v6, %v6250_v34 }
 0x1ea   : > { %1993 = vmatprep.subr.mxu1 %v5685_v38  ;;  %1923 = vmatpush1.msra.mxu0 %v5682_v62  ;;  %v2265_v52 = vrot.slane %v2251_v9, %v6026_v5 }
 0x1eb   : > { %1994 = vmatpush1.msra.mxu1 %v5684_v51  ;;  %1924 = vmatprep.subr.mxu0 %v5679_v17 }
 0x1ec   : > { %1995 = vmatprep.subr.mxu1 %v5681_v30  ;;  %1925 = vmatpush1.msra.mxu0 %v5678_v55  ;;  %v2266_v11 = vcombine.low %v2258_v61, %v2265_v52  ;;  %v2267_v13 = vcombine.high %v2258_v61, %v2265_v52 }
 0x1ed   : > { %1958 = vmatprep.mubr.f32.mxu0 %v7744_v53  ;;  %1996 = vmatpush1.msra.mxu1 %v5680_v44 }
 0x1ee   : > { %2029 = vmatprep.mubr.f32.mxu1 %v7744_v53  ;;  %5686 = vmatmul.mubr.msk.f32.vlgmr.msra.gmra.mxu0 %vm831_vm5, %v6125_v63  ;;  %v2274_v16 = vrot.slane %v2266_v11, %v6026_v5  ;;  %v2281_v3 = vrot.slane %v2267_v13, %v6026_v5 }
 0x1ef   : > { %5687 = vmatmul.mubr.msk.f32.vlgmr.msra.gmra.mxu1 %vm831_vm5, %v6125_v63  ;;  %2164 = vmatprep.mubr.f32.mxu0 %v7744_v53 }
 0x1f0   : > { %2235 = vmatprep.mubr.f32.mxu1 %v7744_v53  ;;  %v2282_v24 = vcombine.high %v2274_v16, %v2274_v16  ;;  %v2283_v4 = vcombine.high %v2281_v3, %v2281_v3  ;;  %v6560_v43 = vrot.slane %v2274_v16, %v6038_v18  ;;  %v6563_v49 = vrot.slane %v2281_v3, %v6038_v18 }
 0x1f1   : > { %v6568_v57 = vrot.slane %v2274_v16, %v6040_v19  ;;  %v6571_v23 = vrot.slane %v2281_v3, %v6040_v19  ;;  %v6576_v51 = vrot.slane %v2274_v16, %v6042_v20  ;;  %v6579_v17 = vrot.slane %v2281_v3, %v6042_v20 }
 0x1f2   : > { %v6504_v37 = vrot.slane %v2282_v24, %v6038_v18  ;;  %v6508_v36 = vrot.slane %v2283_v4, %v6038_v18  ;;  %v6511_v58 = vrot.slane %v2282_v24, %v6040_v19  ;;  %v6514_v54 = vrot.slane %v2283_v4, %v6040_v19  ;;  %7771 = vst [vmem:[#allocation40_spill] sm:$0xff] %v6560_v43 }
 0x1f3   : > { %v6520_v45 = vrot.slane %v2282_v24, %v6042_v20  ;;  %v6535_v12 = vrot.slane %v2283_v4, %v6042_v20  ;;  %v6538_v0 = vrot.slane %v2282_v24, %v6044_v21  ;;  %v6541_v56 = vrot.slane %v2283_v4, %v6044_v21  ;;  %7772 = vst [vmem:[#allocation41_spill] sm:$0xff] %v6563_v49 }
 0x1f4   : > { %7765 = vst [vmem:[#allocation16_spill] sm:$0xff] %v6504_v37  ;;  %7766 = vst [vmem:[#allocation17_spill] sm:$0xff] %v6508_v36  ;;  %v6532_v35 = vmul.f32 %v6504_v37, %v6320_v25  ;;  %v6545_v15 = vmul.f32 %v6508_v36, %v6320_v25  ;;  %v6549_v34 = vmul.f32 %v6511_v58, %v6324_v29 }
 0x1f5   : > { %7767 = vst [vmem:[#allocation36_spill] sm:$0xff] %v6511_v58  ;;  %7768 = vst [vmem:[#allocation37_spill] sm:$0xff] %v6514_v54  ;;  %v6553_v10 = vmul.f32 %v6514_v54, %v6324_v29  ;;  %v6557_v7 = vmul.f32 %v6520_v45, %v6318_v2  ;;  %v6585_v55 = vmul.f32 %v6535_v12, %v6318_v2 }
 0x1f6   : > { %7769 = vst [vmem:[#allocation38_spill] sm:$0xff] %v6538_v0  ;;  %7770 = vst [vmem:[#allocation39_spill] sm:$0xff] %v6541_v56  ;;  %v6589_v44 = vmul.f32 %v6538_v0, %v6322_v28  ;;  %v6593_v8 = vmul.f32 %v6541_v56, %v6322_v28  ;;  %v5703_v52 = vcombine.high %v6532_v35, %v6545_v15  ;;  %v7789_v56 = vld [vmem:[#allocation31_spill] sm:$0xff] }
 0x1f7   : > { %7773 = vst [vmem:[#allocation42_spill] sm:$0xff] %v6568_v57  ;;  %7774 = vst [vmem:[#allocation43_spill] sm:$0xff] %v6571_v23  ;;  %v6601_v11 = vmul.f32 %v6560_v43, %v6320_v25  ;;  %v6604_v13 = vrot.slane %v2274_v16, %v6044_v21  ;;  %v2364_v35 = vmul.f32 %v6576_v51, %v6318_v2 }
 0x1f8   : > { %7775 = vst [vmem:[#allocation44_spill] sm:$0xff] %v6576_v51  ;;  %7776 = vst [vmem:[#allocation45_spill] sm:$0xff] %v6579_v17  ;;  %v2368_v16 = vmul.f32 %v6579_v17, %v6318_v2 }
 0x1f9   : > { %7777 = vst [vmem:[#allocation46_spill] sm:$0xff] %v6604_v13  ;;  %v2366_v51 = vmul.f32 %v6604_v13, %v6322_v28 }
 0x2a8   : > { %v1636_v60 = vpop.f32.mrf.mxu0 }
 0x2a9   : > { %v1712_v1 = vmax.f32 %v1636_v60, 0.0  ;;  %v1707_v47 = vpop.f32.mrf.mxu1 }
 0x2aa   : > { %v1714_v6 = vmax.f32 %v1707_v47, 0.0  ;;  %v1638_v27 = vpop.f32.mrf.mxu0 }
 0x2ab   : > { %v6565_v50 = vadd.f32 %v1712_v1, %v1186_v22  ;;  %v1713_v31 = vmax.f32 %v1638_v27, 0.0  ;;  %v1709_v32 = vpop.f32.mrf.mxu1  ;;  %v2369_v22 = vmul.f32 %v6563_v49, %v6320_v25  ;;  %v6617_v1 = vrot.slane %v2281_v3, %v6044_v21  ;;  %v7778_v27 = vld [vmem:[#allocation26_spill] sm:$0xff] }
 0x2ac   : > { %v6573_v38 = vadd.f32 %v1714_v6, %v1188_v26  ;;  %v1715_v62 = vmax.f32 %v1709_v32, 0.0  ;;  %v2367_v26 = vmul.f32 %v6568_v57, %v6324_v29  ;;  %v7779_v32 = vld [vmem:[#allocation27_spill] sm:$0xff]  ;;  %v7782_v3 = vld [vmem:[#allocation22_spill] sm:$0xff] }
 0x2ad   : > { %v6581_v30 = vadd.f32 %v1713_v31, %v1187_v39  ;;  %v2371_v39 = vmul.f32 %v6571_v23, %v6324_v29  ;;  %v7780_v29 = vld [vmem:[#allocation28_spill] sm:$0xff] }
 0x2ae   : > { %v6595_v9 = vadd.f32 %v1715_v62, %v1189_v40  ;;  %v1960_v61 = vpop.f32.mrf.mxu0 }
 0x2af   : > { %v2036_v24 = vmax.f32 %v1960_v61, 0.0  ;;  %v2031_v4 = vpop.f32.mrf.mxu1 }
 0x2b0   : > { %v2038_v40 = vmax.f32 %v2031_v4, 0.0  ;;  %v1962_v60 = vpop.f32.mrf.mxu0 }
 0x2b1   : > { %v6619_v47 = vadd.f32 %v2036_v24, %v1510_v59  ;;  %v2037_v15 = vmax.f32 %v1962_v60, 0.0  ;;  %v2033_v6 = vpop.f32.mrf.mxu1  ;;  %v2052_v31 = vmul.f32 %v2036_v24, %v7778_v27  ;;  %v2056_v62 = vmul.f32 %v2036_v24, %v7779_v32  ;;  %v7783_v59 = vld [vmem:[#allocation23_spill] sm:$0xff]  ;;  %v7784_v60 = vld [vmem:[#allocation29_spill] sm:$0xff]  ;;  %v7786_v27 = vld [vmem:[#allocation24_spill] sm:$0xff] }
 0x2b2   : > { %v6623_v61 = vadd.f32 %v2038_v40, %v1512_v46  ;;  %v2039_v4 = vmax.f32 %v2033_v6, 0.0  ;;  %v2054_v25 = vmul.f32 %v2038_v40, %v7780_v29  ;;  %v2058_v57 = vmul.f32 %v2038_v40, %v7784_v60  ;;  %v7787_v46 = vld [vmem:[#allocation25_spill] sm:$0xff]  ;;  %v7788_v29 = vld [vmem:[#allocation30_spill] sm:$0xff]  ;;  %v7793_v60 = vld [vmem:[#allocation35_spill] sm:$0xff] }
 0x2b3   : > { %v6628_v2 = vadd.f32 %v2037_v15, %v1511_v41  ;;  %v2053_v17 = vmul.f32 %v2037_v15, %v7782_v3  ;;  %v2057_v23 = vmul.f32 %v2037_v15, %v7783_v59  ;;  %v5692_v6 = vcombine.low %v2052_v31, %v2056_v62  ;;  %v7790_v41 = vld [vmem:[#allocation32_spill] sm:$0xff]  ;;  %v7791_v3 = vld [vmem:[#allocation33_spill] sm:$0xff]  ;;  %v7792_v59 = vld [vmem:[#allocation34_spill] sm:$0xff] }
 0x2b4   : > { %v6633_v49 = vadd.f32 %v2039_v4, %v1513_v42  ;;  %v2055_v32 = vmul.f32 %v2039_v4, %v7786_v27  ;;  %v2059_v43 = vmul.f32 %v2039_v4, %v7787_v46  ;;  %v2045_v58 = vmul.f32 %v2037_v15, %v7788_v29 }
 0x2b5   : > { %7781 = vst [vmem:[#allocation26_spill] sm:$0xff] %v6628_v2  ;;  %v5693_v54 = vcombine.low %v2053_v17, %v2057_v23  ;;  %v2049_v13 = vmul.f32 %v2037_v15, %v7789_v56  ;;  %v2047_v36 = vmul.f32 %v2039_v4, %v7790_v41  ;;  %v2051_v2 = vmul.f32 %v2039_v4, %v7791_v3 }
 0x2b6   : > { %7785 = vst [vmem:[#allocation27_spill] sm:$0xff] %v6633_v49  ;;  %v5695_v37 = vcombine.low %v2055_v32, %v2059_v43  ;;  %v2044_v0 = vmul.f32 %v2036_v24, %v7792_v59  ;;  %v2048_v42 = vmul.f32 %v2036_v24, %v7793_v60  ;;  %v5694_v49 = vcombine.low %v2054_v25, %v2058_v57 }
 0x2b7   : > { %2128 = vmatprep.subr.mxu0 %v5693_v54  ;;  %v5689_v27 = vcombine.low %v2045_v58, %v2049_v13  ;;  %v2046_v46 = vmul.f32 %v2038_v40, %v6427_v48  ;;  %v2050_v23 = vmul.f32 %v2038_v40, %v6444_v14  ;;  %v5691_v17 = vcombine.low %v2047_v36, %v2051_v2  ;;  %v5622_v58 = vld [vmem:[%s5956_s13 + $0x40] sm:$0xff]  }
 0x2b8   : > { %2199 = vmatprep.subr.mxu1 %v5695_v37  ;;  %2129 = vmatpush1.msra.mxu0 %v5692_v6  ;;  %v5688_v56 = vcombine.low %v2044_v0, %v2048_v42  ;;  %v2370_v43 = vmul.f32 %v6617_v1, %v6322_v28  ;;  %v5705_v24 = vcombine.high %v6549_v34, %v6553_v10  ;;  %v449_v54 = vunpack.c.l.bf16 %v5622_v58  ;;  %v7794_v34 = vld [vmem:[#allocation8_spill] sm:$0xff] }
 0x2b9   : > { %2200 = vmatpush1.msra.mxu1 %v5694_v49  ;;  %2130 = vmatprep.subr.mxu0 %v5689_v27  ;;  %v5690_v15 = vcombine.low %v2046_v46, %v2050_v23  ;;  %v5702_v25 = vcombine.high %v6557_v7, %v6585_v55  ;;  %v5704_v48 = vcombine.high %v6589_v44, %v6593_v8  ;;  %v465_v0 = vunpack.c.h.bf16 %v5622_v58  ;;  %v622_v8 = vld [vmem:[#allocation7 + $0x28] sm:$0xff] }
 0x2ba   : > { %2201 = vmatprep.subr.mxu1 %v5691_v17  ;;  %2131 = vmatpush1.msra.mxu0 %v5688_v56  ;;  %v5699_v2 = vcombine.high %v6601_v11, %v2369_v22  ;;  %v5701_v14 = vcombine.high %v2367_v26, %v2371_v39  ;;  %v5698_v37 = vcombine.high %v2364_v35, %v2368_v16  ;;  %v6679_v13 = vunpack.c.l.bf16 %v622_v8  ;;  %v7817_v49 = vld [vmem:[#allocation38_spill] sm:$0xff] }
 0x2bb   : > { %2202 = vmatpush1.msra.mxu1 %v5690_v15  ;;  %5696 = vmatmul.mubr.msk.f32.vlgmr.msra.gmra.mxu0 %vm831_vm5, %v6280_v33  ;;  %v5700_v36 = vcombine.high %v2366_v51, %v2370_v43  ;;  %v457_v7 = vsel %vm287_vm0, %v449_v54, %v7794_v34  ;;  %v474_v57 = vsel %vm303_vm1, %v465_v0, %v7794_v34  ;;  %v6681_v22 = vunpack.c.h.bf16 %v622_v8 }
 0x2bc   : > { %5697 = vmatmul.mubr.msk.f32.vlgmr.msra.gmra.mxu1 %vm831_vm5, %v6280_v33  ;;  %2448 = vmatprep.subr.mxu0 %v5703_v52  ;;  %v459_v51 = vpack.c.bf16 %v7744_v53, %v457_v7  ;;  %v476_v55 = vpack.c.bf16 %v7744_v53, %v474_v57  ;;  %7799 = vst [vmem:[#allocation23_spill] sm:$0xff] %v6679_v13 }
 0x2bd   : > { %2519 = vmatprep.subr.mxu1 %v5705_v24  ;;  %2449 = vmatpush1.msra.mxu0 %v5702_v25  ;;  %7800 = vst [vmem:[#allocation29_spill] sm:$0xff] %v6681_v22  ;;  %v2781_v39 = vcombine.low %v6679_v13, %v6681_v22 }
 0x2be   : > { %2520 = vmatpush1.msra.mxu1 %v5704_v48  ;;  %2450 = vmatprep.subr.mxu0 %v5699_v2  ;;  %462 = vst [vmem:[#allocation7 + $0x20] sm:$0xf] %v459_v51  ;;  %479 = vst [vmem:[#allocation7 + $0x24] sm:$0xf] %v476_v55 }
 0x2bf   : > { %2521 = vmatprep.subr.mxu1 %v5701_v14  ;;  %2451 = vmatpush1.msra.mxu0 %v5698_v37  ;;  %v2795_v35 = vrot.slane %v2781_v39, %v6026_v5 }
 0x2c0   : > { %2484 = vmatprep.mubr.f32.mxu0 %v7744_v53  ;;  %2522 = vmatpush1.msra.mxu1 %v5700_v36 }
 0x2c1   : > { %2555 = vmatprep.mubr.f32.mxu1 %v7744_v53  ;;  %5706 = vmatmul.mubr.msk.f32.vlgmr.msra.gmra.mxu0 %vm831_vm5, %v6125_v63 }
 0x2c2   : > { %5707 = vmatmul.mubr.msk.f32.vlgmr.msra.gmra.mxu1 %vm831_vm5, %v6125_v63  ;;  %2690 = vmatprep.mubr.f32.mxu0 %v7744_v53 }
 0x2c3   : > { %2761 = vmatprep.mubr.f32.mxu1 %v7744_v53 }
 0x2c5   : > { %v621_v44 = vld [vmem:[#allocation7 + $0x20] sm:$0xff] }
 0x2c6   : > { %v6675_v52 = vunpack.c.l.bf16 %v621_v44  ;;  %v6677_v11 = vunpack.c.h.bf16 %v621_v44 }
 0x2c8   : > { %7797 = vst [vmem:[#allocation28_spill] sm:$0xff] %v6675_v52  ;;  %7798 = vst [vmem:[#allocation22_spill] sm:$0xff] %v6677_v11  ;;  %v2780_v26 = vcombine.low %v6675_v52, %v6677_v11 }
 0x2ca   : > { %v2788_v40 = vrot.slane %v2780_v26, %v6026_v5 }
 0x2cc   : > { %v2796_v16 = vcombine.low %v2788_v40, %v2795_v35  ;;  %v2797_v31 = vcombine.high %v2788_v40, %v2795_v35 }
 0x2ce   : > { %v2804_v62 = vrot.slane %v2796_v16, %v6026_v5  ;;  %v2811_v4 = vrot.slane %v2797_v31, %v6026_v5 }
 0x2d0   : > { %v2812_v32 = vcombine.high %v2804_v62, %v2804_v62  ;;  %v2813_v6 = vcombine.high %v2811_v4, %v2811_v4  ;;  %v6736_v37 = vrot.slane %v2804_v62, %v6038_v18  ;;  %v6739_v36 = vrot.slane %v2811_v4, %v6038_v18 }
 0x2d1   : > { %v6745_v7 = vrot.slane %v2804_v62, %v6040_v19  ;;  %v6748_v57 = vrot.slane %v2811_v4, %v6040_v19  ;;  %v6754_v44 = vrot.slane %v2804_v62, %v6042_v20  ;;  %v6757_v8 = vrot.slane %v2811_v4, %v6042_v20 }
 0x2d2   : > { %v6692_v29 = vrot.slane %v2812_v32, %v6038_v18  ;;  %v6695_v41 = vrot.slane %v2813_v6, %v6038_v18  ;;  %v6698_v3 = vrot.slane %v2812_v32, %v6040_v19  ;;  %v6701_v59 = vrot.slane %v2813_v6, %v6040_v19  ;;  %7809 = vst [vmem:[#allocation47_spill] sm:$0xff] %v6736_v37 }
 0x2d3   : > { %v6704_v60 = vrot.slane %v2812_v32, %v6042_v20  ;;  %v6711_v46 = vrot.slane %v2813_v6, %v6042_v20  ;;  %v6714_v23 = vrot.slane %v2812_v32, %v6044_v21  ;;  %v6717_v17 = vrot.slane %v2813_v6, %v6044_v21  ;;  %7810 = vst [vmem:[#allocation48_spill] sm:$0xff] %v6739_v36 }
 0x2d4   : > { %7801 = vst [vmem:[#allocation24_spill] sm:$0xff] %v6692_v29  ;;  %7802 = vst [vmem:[#allocation25_spill] sm:$0xff] %v6695_v41  ;;  %v6708_v27 = vmul.f32 %v6692_v29, %v6677_v11  ;;  %v6721_v15 = vmul.f32 %v6695_v41, %v6677_v11  ;;  %v6725_v24 = vmul.f32 %v6698_v3, %v6681_v22  ;;  %v7828_v41 = vld [vmem:[#allocation41_spill] sm:$0xff]  ;;  %v7829_v29 = vld [vmem:[#allocation42_spill] sm:$0xff] }
 0x2d5   : > { %7803 = vst [vmem:[#allocation30_spill] sm:$0xff] %v6698_v3  ;;  %7804 = vst [vmem:[#allocation31_spill] sm:$0xff] %v6701_v59  ;;  %v6729_v25 = vmul.f32 %v6701_v59, %v6681_v22  ;;  %v6733_v14 = vmul.f32 %v6704_v60, %v6675_v52  ;;  %v6764_v26 = vmul.f32 %v6711_v46, %v6675_v52 }
 0x2d6   : > { %7805 = vst [vmem:[#allocation32_spill] sm:$0xff] %v6704_v60  ;;  %7806 = vst [vmem:[#allocation33_spill] sm:$0xff] %v6711_v46  ;;  %v6768_v39 = vmul.f32 %v6714_v23, %v6679_v13  ;;  %v6781_v16 = vmul.f32 %v6736_v37, %v6677_v11  ;;  %v6784_v31 = vrot.slane %v2804_v62, %v6044_v21  ;;  %v7832_v46 = vld [vmem:[#allocation45_spill] sm:$0xff]  ;;  %v7833_v60 = vld [vmem:[#allocation46_spill] sm:$0xff] }
 0x2d7   : > { %7807 = vst [vmem:[#allocation34_spill] sm:$0xff] %v6714_v23  ;;  %7808 = vst [vmem:[#allocation35_spill] sm:$0xff] %v6717_v17  ;;  %v2898_v62 = vmul.f32 %v6757_v8, %v6675_v52  ;;  %v7830_v23 = vld [vmem:[#allocation43_spill] sm:$0xff] }
 0x2d8   : > { %7811 = vst [vmem:[#allocation49_spill] sm:$0xff] %v6745_v7  ;;  %7812 = vst [vmem:[#allocation50_spill] sm:$0xff] %v6748_v57  ;;  %v2896_v34 = vmul.f32 %v6784_v31, %v6679_v13 }
 0x2d9   : > { %7813 = vst [vmem:[#allocation51_spill] sm:$0xff] %v6754_v44  ;;  %7814 = vst [vmem:[#allocation52_spill] sm:$0xff] %v6757_v8 }
 0x2da   : > { %7815 = vst [vmem:[#allocation53_spill] sm:$0xff] %v6784_v31 }
 0x37b   : > { %v2166_v42 = vpop.f32.mrf.mxu0 }
 0x37c   : > { %v2242_v56 = vmax.f32 %v2166_v42, 0.0  ;;  %v2237_v43 = vpop.f32.mrf.mxu1  ;;  %v2899_v42 = vmul.f32 %v6739_v36, %v6677_v11  ;;  %v7823_v36 = vld [vmem:[#allocation27_spill] sm:$0xff] }
 0x37d   : > { %v2244_v48 = vmax.f32 %v2237_v43, 0.0  ;;  %v2168_v2 = vpop.f32.mrf.mxu0 }
 0x37e   : > { %v6742_v58 = vadd.f32 %v2242_v56, %v6565_v50  ;;  %v2243_v54 = vmax.f32 %v2168_v2, 0.0  ;;  %v2239_v0 = vpop.f32.mrf.mxu1  ;;  %v2901_v56 = vmul.f32 %v6748_v57, %v6681_v22 }
 0x37f   : > { %v6751_v51 = vadd.f32 %v2244_v48, %v6573_v38  ;;  %v2245_v55 = vmax.f32 %v2239_v0, 0.0  ;;  %v6772_v38 = vmul.f32 %v6717_v17, %v6679_v13  ;;  %v6797_v48 = vrot.slane %v2811_v4, %v6044_v21  ;;  %v7818_v4 = vld [vmem:[#allocation26_spill] sm:$0xff]  ;;  %v7827_v17 = vld [vmem:[#allocation40_spill] sm:$0xff] }
 0x380   : > { %v6760_v50 = vadd.f32 %v2243_v54, %v6581_v30  ;;  %v5723_v30 = vcombine.low %v6708_v27, %v6721_v15  ;;  %v2894_v15 = vmul.f32 %v6754_v44, %v6675_v52 }
 0x381   : > { %v6775_v40 = vadd.f32 %v2245_v55, %v6595_v9  ;;  %v2486_v35 = vpop.f32.mrf.mxu0  ;;  %v2897_v9 = vmul.f32 %v6745_v7, %v6681_v22  ;;  %v7822_v7 = vld [vmem:[#allocation39_spill] sm:$0xff] }
 0x382   : > { %v2562_v32 = vmax.f32 %v2486_v35, 0.0  ;;  %v2557_v6 = vpop.f32.mrf.mxu1 }
 0x383   : > { %v2564_v43 = vmax.f32 %v2557_v6, 0.0  ;;  %v2488_v27 = vpop.f32.mrf.mxu0 }
 0x384   : > { %v6800_v2 = vadd.f32 %v2562_v32, %v6619_v47  ;;  %v2563_v54 = vmax.f32 %v2488_v27, 0.0  ;;  %v2559_v0 = vpop.f32.mrf.mxu1  ;;  %v2578_v55 = vmul.f32 %v2562_v32, %v6520_v45  ;;  %v2582_v35 = vmul.f32 %v2562_v32, %v6535_v12  ;;  %v7820_v47 = vld [vmem:[#allocation16_spill] sm:$0xff]  ;;  %v7821_v27 = vld [vmem:[#allocation17_spill] sm:$0xff] }
 0x385   : > { %v6805_v6 = vadd.f32 %v2564_v43, %v6623_v61  ;;  %v2565_v28 = vmax.f32 %v2559_v0, 0.0  ;;  %v2580_v10 = vmul.f32 %v2564_v43, %v7817_v49  ;;  %v2584_v45 = vmul.f32 %v2564_v43, %v7822_v7  ;;  %v7825_v61 = vld [vmem:[#allocation36_spill] sm:$0xff]  ;;  %v7826_v0 = vld [vmem:[#allocation37_spill] sm:$0xff] }
 0x386   : > { %v6811_v8 = vadd.f32 %v2563_v54, %v7818_v4  ;;  %v2579_v44 = vmul.f32 %v2563_v54, %v7820_v47  ;;  %v2583_v57 = vmul.f32 %v2563_v54, %v7821_v27  ;;  %v5712_v49 = vcombine.low %v2578_v55, %v2582_v35 }
 0x387   : > { %7816 = vst [vmem:[#allocation54_spill] sm:$0xff] %v6805_v6  ;;  %v6817_v12 = vadd.f32 %v2565_v28, %v7823_v36  ;;  %v2581_v37 = vmul.f32 %v2565_v28, %v7825_v61  ;;  %v2585_v59 = vmul.f32 %v2565_v28, %v7826_v0  ;;  %v2571_v31 = vmul.f32 %v2563_v54, %v7827_v17  ;;  %v7831_v6 = vld [vmem:[#allocation44_spill] sm:$0xff] }
 0x388   : > { %7819 = vst [vmem:[#allocation38_spill] sm:$0xff] %v6811_v8  ;;  %v5713_v3 = vcombine.low %v2579_v44, %v2583_v57  ;;  %v2575_v4 = vmul.f32 %v2563_v54, %v7828_v41  ;;  %v2573_v8 = vmul.f32 %v2565_v28, %v7829_v29  ;;  %v2577_v27 = vmul.f32 %v2565_v28, %v7830_v23 }
 0x389   : > { %7824 = vst [vmem:[#allocation26_spill] sm:$0xff] %v6817_v12  ;;  %v5715_v47 = vcombine.low %v2581_v37, %v2585_v59  ;;  %v2570_v7 = vmul.f32 %v2562_v32, %v7831_v6  ;;  %v2574_v36 = vmul.f32 %v2562_v32, %v7832_v46  ;;  %v5714_v12 = vcombine.low %v2580_v10, %v2584_v45 }
 0x38a   : > { %2654 = vmatprep.subr.mxu0 %v5713_v3  ;;  %v5709_v61 = vcombine.low %v2571_v31, %v2575_v4  ;;  %v2572_v0 = vmul.f32 %v2564_v43, %v7833_v60  ;;  %v2576_v57 = vmul.f32 %v2564_v43, %v6617_v1  ;;  %v5711_v17 = vcombine.low %v2573_v8, %v2577_v27 }
 0x38b   : > { %2725 = vmatprep.subr.mxu1 %v5715_v47  ;;  %2655 = vmatpush1.msra.mxu0 %v5712_v49  ;;  %v5708_v41 = vcombine.low %v2570_v7, %v2574_v36  ;;  %v2900_v29 = vmul.f32 %v6797_v48, %v6679_v13  ;;  %v5725_v59 = vcombine.low %v6725_v24, %v6729_v25 }
 0x38c   : > { %2726 = vmatpush1.msra.mxu1 %v5714_v12  ;;  %2656 = vmatprep.subr.mxu0 %v5709_v61  ;;  %v5710_v28 = vcombine.low %v2572_v0, %v2576_v57  ;;  %v5722_v10 = vcombine.low %v6733_v14, %v6764_v26  ;;  %v5724_v1 = vcombine.low %v6768_v39, %v6772_v38 }
 0x38d   : > { %2727 = vmatprep.subr.mxu1 %v5711_v17  ;;  %2657 = vmatpush1.msra.mxu0 %v5708_v41  ;;  %v5719_v3 = vcombine.low %v6781_v16, %v2899_v42  ;;  %v5721_v60 = vcombine.low %v2897_v9, %v2901_v56  ;;  %v5718_v46 = vcombine.low %v2894_v15, %v2898_v62 }
 0x38e   : > { %2728 = vmatpush1.msra.mxu1 %v5710_v28  ;;  %5716 = vmatmul.mubr.msk.f32.vlgmr.msra.gmra.mxu0 %vm831_vm5, %v6280_v33  ;;  %v5720_v23 = vcombine.low %v2896_v34, %v2900_v29  ;;  %v3307_v34 = vcombine.high %v6679_v13, %v6681_v22 }
 0x38f   : > { %5717 = vmatmul.mubr.msk.f32.vlgmr.msra.gmra.mxu1 %vm831_vm5, %v6280_v33  ;;  %2978 = vmatprep.subr.mxu0 %v5723_v30  ;;  %v3306_v33 = vcombine.high %v6675_v52, %v6677_v11 }
 0x390   : > { %3049 = vmatprep.subr.mxu1 %v5725_v59  ;;  %2979 = vmatpush1.msra.mxu0 %v5722_v10  ;;  %v3321_v25 = vrot.slane %v3307_v34, %v6026_v5 }
 0x391   : > { %3050 = vmatpush1.msra.mxu1 %v5724_v1  ;;  %2980 = vmatprep.subr.mxu0 %v5719_v3  ;;  %v3314_v24 = vrot.slane %v3306_v33, %v6026_v5 }
 0x392   : > { %3051 = vmatprep.subr.mxu1 %v5721_v60  ;;  %2981 = vmatpush1.msra.mxu0 %v5718_v46 }
 0x393   : > { %3014 = vmatprep.mubr.f32.mxu0 %v7744_v53  ;;  %3052 = vmatpush1.msra.mxu1 %v5720_v23  ;;  %v3322_v14 = vcombine.low %v3314_v24, %v3321_v25  ;;  %v3323_v37 = vcombine.high %v3314_v24, %v3321_v25 }
 0x394   : > { %3085 = vmatprep.mubr.f32.mxu1 %v7744_v53  ;;  %5726 = vmatmul.mubr.msk.f32.vlgmr.msra.gmra.mxu0 %vm831_vm5, %v6125_v63 }
 0x395   : > { %5727 = vmatmul.mubr.msk.f32.vlgmr.msra.gmra.mxu1 %vm831_vm5, %v6125_v63  ;;  %3220 = vmatprep.mubr.f32.mxu0 %v7744_v53  ;;  %v3330_v44 = vrot.slane %v3322_v14, %v6026_v5  ;;  %v3337_v63 = vrot.slane %v3323_v37, %v6026_v5 }
 0x396   : > { %3291 = vmatprep.mubr.f32.mxu1 %v7744_v53 }
 0x397   : > { %v3338_v8 = vcombine.high %v3330_v44, %v3330_v44  ;;  %v3339_v26 = vcombine.high %v3337_v63, %v3337_v63  ;;  %v6903_v49 = vrot.slane %v3330_v44, %v6038_v18  ;;  %v6906_v4 = vrot.slane %v3337_v63, %v6038_v18 }
 0x398   : > { %v6912_v36 = vrot.slane %v3330_v44, %v6040_v19  ;;  %v6915_v61 = vrot.slane %v3337_v63, %v6040_v19  ;;  %v6921_v17 = vrot.slane %v3330_v44, %v6042_v20  ;;  %v6924_v41 = vrot.slane %v3337_v63, %v6042_v20 }
 0x399   : > { %v6859_v39 = vrot.slane %v3338_v8, %v6038_v18  ;;  %v6862_v38 = vrot.slane %v3339_v26, %v6038_v18  ;;  %v6865_v30 = vrot.slane %v3338_v8, %v6040_v19  ;;  %v6868_v16 = vrot.slane %v3339_v26, %v6040_v19  ;;  %7839 = vst [vmem:[#allocation37_spill] sm:$0xff] %v6903_v49 }
 0x39a   : > { %v6871_v31 = vrot.slane %v3338_v8, %v6042_v20  ;;  %v6878_v9 = vrot.slane %v3339_v26, %v6042_v20  ;;  %v6881_v56 = vrot.slane %v3338_v8, %v6044_v21  ;;  %v6884_v43 = vrot.slane %v3339_v26, %v6044_v21  ;;  %7840 = vst [vmem:[#allocation40_spill] sm:$0xff] %v6906_v4 }
 0x39b   : > { %7834 = vst [vmem:[#allocation16_spill] sm:$0xff] %v6859_v39  ;;  %7835 = vst [vmem:[#allocation17_spill] sm:$0xff] %v6862_v38  ;;  %v6875_v42 = vmul.f32 %v6859_v39, %v6677_v11  ;;  %v6888_v54 = vmul.f32 %v6862_v38, %v6677_v11  ;;  %v6892_v55 = vmul.f32 %v6865_v30, %v6681_v22  ;;  %v7863_v38 = vld [vmem:[#allocation51_spill] sm:$0xff]  ;;  %v7864_v39 = vld [vmem:[#allocation52_spill] sm:$0xff] }
 0x39c   : > { %7836 = vst [vmem:[#allocation39_spill] sm:$0xff] %v6865_v30  ;;  %7837 = vst [vmem:[#allocation27_spill] sm:$0xff] %v6868_v16  ;;  %v6896_v35 = vmul.f32 %v6868_v16, %v6681_v22  ;;  %v6900_v12 = vmul.f32 %v6871_v31, %v6675_v52  ;;  %v6931_v29 = vmul.f32 %v6878_v9, %v6675_v52  ;;  %v7861_v16 = vld [vmem:[#allocation49_spill] sm:$0xff] }
 0x39d   : > { %7838 = vst [vmem:[#allocation36_spill] sm:$0xff] %v6884_v43  ;;  %7841 = vst [vmem:[#allocation41_spill] sm:$0xff] %v6912_v36  ;;  %v6935_v28 = vmul.f32 %v6881_v56, %v6679_v13  ;;  %v6948_v1 = vmul.f32 %v6903_v49, %v6677_v11  ;;  %v6951_v3 = vrot.slane %v3330_v44, %v6044_v21  ;;  %v7860_v49 = vld [vmem:[#allocation48_spill] sm:$0xff] }
 0x39e   : > { %7842 = vst [vmem:[#allocation42_spill] sm:$0xff] %v6915_v61  ;;  %7843 = vst [vmem:[#allocation43_spill] sm:$0xff] %v6921_v17  ;;  %v6955_v23 = vmul.f32 %v6906_v4, %v6677_v11  ;;  %v3427_v33 = vmul.f32 %v6915_v61, %v6681_v22  ;;  %v3420_v25 = vmul.f32 %v6921_v17, %v6675_v52  ;;  %v7854_v11 = vld [vmem:[#allocation35_spill] sm:$0xff] }
 0x39f   : > { %7844 = vst [vmem:[#allocation44_spill] sm:$0xff] %v6924_v41  ;;  %7845 = vst [vmem:[#allocation45_spill] sm:$0xff] %v6951_v3  ;;  %v3424_v14 = vmul.f32 %v6924_v41, %v6675_v52  ;;  %v6968_v37 = vrot.slane %v3337_v63, %v6044_v21  ;;  %v7850_v63 = vld [vmem:[#allocation38_spill] sm:$0xff]  ;;  %v7859_v4 = vld [vmem:[#allocation47_spill] sm:$0xff] }
 0x3a0   : > { %v7855_v41 = vld [vmem:[#allocation26_spill] sm:$0xff] }
 0x44e   : > { %v2692_v32 = vpop.f32.mrf.mxu0 }
 0x44f   : > { %v2768_v15 = vmax.f32 %v2692_v32, 0.0  ;;  %v2763_v62 = vpop.f32.mrf.mxu1  ;;  %v7846_v32 = vld [vmem:[#allocation32_spill] sm:$0xff] }
 0x450   : > { %v2770_v6 = vmax.f32 %v2763_v62, 0.0  ;;  %v2694_v45 = vpop.f32.mrf.mxu0  ;;  %v7847_v62 = vld [vmem:[#allocation33_spill] sm:$0xff] }
 0x451   : > { %v6909_v47 = vadd.f32 %v2768_v15, %v6742_v58  ;;  %v2769_v27 = vmax.f32 %v2694_v45, 0.0  ;;  %v2765_v7 = vpop.f32.mrf.mxu1  ;;  %v7848_v45 = vld [vmem:[#allocation54_spill] sm:$0xff] }
 0x452   : > { %v6918_v0 = vadd.f32 %v2770_v6, %v6751_v51  ;;  %v2771_v57 = vmax.f32 %v2765_v7, 0.0  ;;  %v6939_v51 = vmul.f32 %v6884_v43, %v6679_v13  ;;  %v7862_v43 = vld [vmem:[#allocation50_spill] sm:$0xff] }
 0x453   : > { %v6927_v58 = vadd.f32 %v2769_v27, %v6760_v50 }
 0x454   : > { %v6942_v59 = vadd.f32 %v2771_v57, %v6775_v40  ;;  %v3016_v10 = vpop.f32.mrf.mxu0  ;;  %v6959_v40 = vmul.f32 %v6912_v36, %v6681_v22  ;;  %v7849_v57 = vld [vmem:[#allocation34_spill] sm:$0xff] }
 0x455   : > { %v3092_v60 = vmax.f32 %v3016_v10, 0.0  ;;  %v3087_v46 = vpop.f32.mrf.mxu1 }
 0x456   : > { %v3094_v34 = vmax.f32 %v3087_v46, 0.0  ;;  %v3018_v24 = vpop.f32.mrf.mxu0  ;;  %v3422_v46 = vmul.f32 %v6951_v3, %v6679_v13 }
 0x457   : > { %v6971_v44 = vadd.f32 %v3092_v60, %v6800_v2  ;;  %v3093_v8 = vmax.f32 %v3018_v24, 0.0  ;;  %v3089_v26 = vpop.f32.mrf.mxu1  ;;  %v3108_v15 = vmul.f32 %v3092_v60, %v7846_v32  ;;  %v3112_v6 = vmul.f32 %v3092_v60, %v7847_v62  ;;  %v7852_v2 = vld [vmem:[#allocation24_spill] sm:$0xff]  ;;  %v7853_v24 = vld [vmem:[#allocation25_spill] sm:$0xff] }
 0x458   : > { %v6976_v27 = vadd.f32 %v3094_v34, %v7848_v45  ;;  %v3095_v7 = vmax.f32 %v3089_v26, 0.0  ;;  %v3110_v10 = vmul.f32 %v3094_v34, %v7849_v57  ;;  %v3114_v32 = vmul.f32 %v3094_v34, %v7854_v11  ;;  %v7857_v45 = vld [vmem:[#allocation30_spill] sm:$0xff]  ;;  %v7858_v26 = vld [vmem:[#allocation31_spill] sm:$0xff] }
 0x459   : > { %v6982_v50 = vadd.f32 %v3093_v8, %v7850_v63  ;;  %v3109_v52 = vmul.f32 %v3093_v8, %v7852_v2  ;;  %v3113_v22 = vmul.f32 %v3093_v8, %v7853_v24  ;;  %v5732_v57 = vcombine.low %v3108_v15, %v3112_v6 }
 0x45a   : > { %v6988_v62 = vadd.f32 %v3095_v7, %v7855_v41  ;;  %v3111_v17 = vmul.f32 %v3095_v7, %v7857_v45  ;;  %v3115_v61 = vmul.f32 %v3095_v7, %v7858_v26  ;;  %v3101_v3 = vmul.f32 %v3093_v8, %v7859_v4  ;;  %v7013_v4 = vld [vmem:[%s7618_s1] sm:$0xf] }
 0x45b   : > { %7851 = vst [vmem:[#allocation46_spill] sm:$0xff] %v6982_v50  ;;  %v5733_v36 = vcombine.low %v3109_v52, %v3113_v22  ;;  %v3105_v63 = vmul.f32 %v3093_v8, %v7860_v49  ;;  %v3103_v30 = vmul.f32 %v3095_v7, %v7861_v16  ;;  %v3107_v24 = vmul.f32 %v3095_v7, %v7862_v43  ;;  %v7865_v50 = vld [vmem:[#allocation53_spill] sm:$0xff] }
 0x45c   : > { %7856 = vst [vmem:[#allocation32_spill] sm:$0xff] %v6988_v62  ;;  %v5735_v2 = vcombine.low %v3111_v17, %v3115_v61  ;;  %v3100_v11 = vmul.f32 %v3092_v60, %v7863_v38  ;;  %v3104_v41 = vmul.f32 %v3092_v60, %v7864_v39  ;;  %v5734_v62 = vcombine.low %v3110_v10, %v3114_v32  ;;  %v7028_v61 = vld [vmem:[%s7617_s0] sm:$0xf] }
 0x45d   : > { %3184 = vmatprep.subr.mxu0 %v5733_v36  ;;  %v5729_v45 = vcombine.low %v3101_v3, %v3105_v63  ;;  %v3102_v26 = vmul.f32 %v3094_v34, %v7865_v50  ;;  %v3106_v52 = vmul.f32 %v3094_v34, %v6797_v48  ;;  %v5731_v22 = vcombine.low %v3103_v30, %v3107_v24 }
 0x45e   : > { %3255 = vmatprep.subr.mxu1 %v5735_v2  ;;  %3185 = vmatpush1.msra.mxu0 %v5732_v57  ;;  %v5728_v49 = vcombine.low %v3100_v11, %v3104_v41  ;;  %v3426_v16 = vmul.f32 %v6968_v37, %v6679_v13  ;;  %v5745_v39 = vcombine.high %v6892_v55, %v6896_v35 }
 0x45f   : > { %3256 = vmatpush1.msra.mxu1 %v5734_v62  ;;  %3186 = vmatprep.subr.mxu0 %v5729_v45  ;;  %v5730_v43 = vcombine.low %v3102_v26, %v3106_v52  ;;  %v5742_v38 = vcombine.high %v6900_v12, %v6931_v29  ;;  %v5744_v48 = vcombine.high %v6935_v28, %v6939_v51  ;;  %v7867_v29 = vld [vmem:[#allocation8_spill] sm:$0xff] }
 0x460   : > { %3257 = vmatprep.subr.mxu1 %v5731_v22  ;;  %3187 = vmatpush1.msra.mxu0 %v5728_v49  ;;  %v5739_v30 = vcombine.high %v6948_v1, %v6955_v23  ;;  %v5741_v55 = vcombine.high %v6959_v40, %v3427_v33  ;;  %v5738_v35 = vcombine.high %v3420_v25, %v3424_v14  ;;  %v624_v40 = vld [vmem:[#allocation7 + $0x38] sm:$0xff] }
 0x461   : > { %3258 = vmatpush1.msra.mxu1 %v5730_v43  ;;  %5736 = vmatmul.mubr.msk.f32.vlgmr.msra.gmra.mxu0 %vm831_vm5, %v7013_v4  ;;  %v7866_v12 = vcombine.high %v6875_v42, %v6888_v54  ;;  %v5740_v36 = vcombine.high %v3422_v46, %v3426_v16  ;;  %v5630_v42 = vld [vmem:[%s5956_s13 + $0x60] sm:$0xff]   ;;  %v7049_v25 = vunpack.c.l.bf16 %v624_v40  ;;  %v7051_v14 = vunpack.c.h.bf16 %v624_v40  ;;  %s277_s13 = scalar_lea.vmem %s7624_s7, %s7959_s28 }
 0x462   : > { %5737 = vmatmul.mubr.msk.f32.vlgmr.msra.gmra.mxu1 %vm831_vm5, %v7013_v4  ;;  %3575 = vmatprep.subr.mxu1 %v5745_v39  ;;  %v534_v54 = vunpack.c.l.bf16 %v5630_v42  ;;  %v550_v17 = vunpack.c.h.bf16 %v5630_v42 }
 0x463   : > { %3504 = vmatprep.subr.mxu0 %v7866_v12  ;;  %3576 = vmatpush1.msra.mxu1 %v5744_v48  ;;  %7872 = vst [vmem:[#allocation34_spill] sm:$0xff] %v7049_v25  ;;  %7873 = vst [vmem:[#allocation38_spill] sm:$0xff] %v7051_v14  ;;  %v3837_v15 = vcombine.low %v7049_v25, %v7051_v14 }
 0x464   : > { %3505 = vmatpush1.msra.mxu0 %v5742_v38  ;;  %3577 = vmatprep.subr.mxu1 %v5741_v55  ;;  %v542_v51 = vsel %vm287_vm0, %v534_v54, %v7867_v29  ;;  %v559_v1 = vsel %vm303_vm1, %v550_v17, %v7867_v29 }
 0x465   : > { %3506 = vmatprep.subr.mxu0 %v5739_v30  ;;  %3540 = vmatprep.mubr.f32.mxu0 %v7744_v53  ;;  %v544_v3 = vpack.c.bf16 %v7744_v53, %v542_v51  ;;  %v561_v60 = vpack.c.bf16 %v7744_v53, %v559_v1  ;;  %v3851_v7 = vrot.slane %v3837_v15, %v6026_v5 }
 0x466   : > { %3507 = vmatpush1.msra.mxu0 %v5738_v35  ;;  %3578 = vmatpush1.msra.mxu1 %v5740_v36 }
 0x467   : > { %3611 = vmatprep.mubr.f32.mxu1 %v7744_v53  ;;  %5746 = vmatmul.mubr.msk.f32.vlgmr.msra.gmra.mxu0 %vm831_vm5, %v7028_v61  ;;  %547 = vst [vmem:[#allocation7 + $0x30] sm:$0xf] %v544_v3  ;;  %564 = vst [vmem:[#allocation7 + $0x34] sm:$0xf] %v561_v60 }
 0x468   : > { %5747 = vmatmul.mubr.msk.f32.vlgmr.msra.gmra.mxu1 %vm831_vm5, %v7028_v61  ;;  %3746 = vmatprep.mubr.f32.mxu0 %v7744_v53 }
 0x469   : > { %3817 = vmatprep.mubr.f32.mxu1 %v7744_v53 }
 0x46e   : > { %v623_v23 = vld [vmem:[#allocation7 + $0x30] sm:$0xff] }
 0x46f   : > { %v7045_v33 = vunpack.c.l.bf16 %v623_v23  ;;  %v7047_v34 = vunpack.c.h.bf16 %v623_v23 }
 0x471   : > { %7870 = vst [vmem:[#allocation33_spill] sm:$0xff] %v7045_v33  ;;  %7871 = vst [vmem:[#allocation54_spill] sm:$0xff] %v7047_v34  ;;  %v3836_v8 = vcombine.low %v7045_v33, %v7047_v34 }
 0x473   : > { %v3844_v6 = vrot.slane %v3836_v8, %v6026_v5 }
 0x475   : > { %v3852_v10 = vcombine.low %v3844_v6, %v3851_v7  ;;  %v3853_v46 = vcombine.high %v3844_v6, %v3851_v7 }
 0x477   : > { %v3860_v32 = vrot.slane %v3852_v10, %v6026_v5  ;;  %v3867_v62 = vrot.slane %v3853_v46, %v6026_v5 }
 0x479   : > { %v3868_v57 = vcombine.high %v3860_v32, %v3860_v32  ;;  %v3869_v63 = vcombine.high %v3867_v62, %v3867_v62  ;;  %v7106_v36 = vrot.slane %v3860_v32, %v6038_v18  ;;  %v7109_v42 = vrot.slane %v3867_v62, %v6038_v18 }
 0x47a   : > { %v7115_v28 = vrot.slane %v3860_v32, %v6040_v19  ;;  %v7118_v51 = vrot.slane %v3867_v62, %v6040_v19  ;;  %v7124_v3 = vrot.slane %v3860_v32, %v6042_v20  ;;  %v7127_v60 = vrot.slane %v3867_v62, %v6042_v20 }
 0x47b   : > { %v7062_v2 = vrot.slane %v3868_v57, %v6038_v18  ;;  %v7065_v24 = vrot.slane %v3869_v63, %v6038_v18  ;;  %v7068_v11 = vrot.slane %v3868_v57, %v6040_v19  ;;  %v7071_v41 = vrot.slane %v3869_v63, %v6040_v19  ;;  %7881 = vst [vmem:[#allocation48_spill] sm:$0xff] %v7106_v36 }
 0x47c   : > { %v7074_v45 = vrot.slane %v3868_v57, %v6042_v20  ;;  %v7081_v22 = vrot.slane %v3869_v63, %v6042_v20  ;;  %v7084_v49 = vrot.slane %v3868_v57, %v6044_v21  ;;  %v7087_v16 = vrot.slane %v3869_v63, %v6044_v21  ;;  %7882 = vst [vmem:[#allocation49_spill] sm:$0xff] %v7109_v42 }
 0x47d   : > { %7874 = vst [vmem:[#allocation24_spill] sm:$0xff] %v7062_v2  ;;  %7875 = vst [vmem:[#allocation25_spill] sm:$0xff] %v7065_v24  ;;  %v7078_v52 = vmul.f32 %v7062_v2, %v7047_v34  ;;  %v7091_v38 = vmul.f32 %v7065_v24, %v7047_v34  ;;  %v7095_v48 = vmul.f32 %v7068_v11, %v7051_v14  ;;  %v7902_v2 = vld [vmem:[#allocation42_spill] sm:$0xff] }
 0x47e   : > { %7876 = vst [vmem:[#allocation35_spill] sm:$0xff] %v7068_v11  ;;  %7877 = vst [vmem:[#allocation26_spill] sm:$0xff] %v7071_v41  ;;  %v7099_v30 = vmul.f32 %v7071_v41, %v7051_v14  ;;  %v7103_v12 = vmul.f32 %v7074_v45, %v7045_v33  ;;  %v7134_v23 = vmul.f32 %v7081_v22, %v7045_v33 }
 0x47f   : > { %7878 = vst [vmem:[#allocation30_spill] sm:$0xff] %v7081_v22  ;;  %7879 = vst [vmem:[#allocation31_spill] sm:$0xff] %v7084_v49  ;;  %v7138_v40 = vmul.f32 %v7084_v49, %v7049_v25  ;;  %v7151_v6 = vmul.f32 %v7106_v36, %v7047_v34  ;;  %v7154_v7 = vrot.slane %v3860_v32, %v6044_v21  ;;  %v7900_v36 = vld [vmem:[#allocation40_spill] sm:$0xff]  ;;  %v7905_v22 = vld [vmem:[#allocation45_spill] sm:$0xff] }
 0x480   : > { %7880 = vst [vmem:[#allocation47_spill] sm:$0xff] %v7087_v16  ;;  %7883 = vst [vmem:[#allocation50_spill] sm:$0xff] %v7115_v28  ;;  %v3955_v57 = vmul.f32 %v7109_v42, %v7047_v34  ;;  %v3957_v63 = vmul.f32 %v7118_v51, %v7051_v14  ;;  %v3954_v32 = vmul.f32 %v7127_v60, %v7045_v33  ;;  %v7895_v42 = vld [vmem:[#allocation32_spill] sm:$0xff] }
 0x481   : > { %7884 = vst [vmem:[#allocation51_spill] sm:$0xff] %v7118_v51  ;;  %7885 = vst [vmem:[#allocation52_spill] sm:$0xff] %v7124_v3  ;;  %v3952_v13 = vmul.f32 %v7154_v7, %v7049_v25  ;;  %v7904_v49 = vld [vmem:[#allocation44_spill] sm:$0xff] }
 0x482   : > { %7886 = vst [vmem:[#allocation53_spill] sm:$0xff] %v7127_v60  ;;  %7887 = vst [vmem:[#allocation9_spill] sm:$0xff] %v7154_v7  ;;  %v7894_v60 = vld [vmem:[#allocation36_spill] sm:$0xff] }
 0x521   : > { %v3222_v26 = vpop.f32.mrf.mxu0 }
 0x522   : > { %v3298_v43 = vmax.f32 %v3222_v26, 0.0  ;;  %v3293_v39 = vpop.f32.mrf.mxu1 }
 0x523   : > { %v3300_v55 = vmax.f32 %v3293_v39, 0.0  ;;  %v3224_v35 = vpop.f32.mrf.mxu0  ;;  %v7167_v39 = vrot.slane %v3867_v62, %v6044_v21  ;;  %v7890_v62 = vld [vmem:[#allocation46_spill] sm:$0xff] }
 0x524   : > { %v7112_v54 = vadd.f32 %v3298_v43, %v6909_v47  ;;  %v3299_v17 = vmax.f32 %v3224_v35, 0.0  ;;  %v3295_v29 = vpop.f32.mrf.mxu1  ;;  %v3950_v43 = vmul.f32 %v7124_v3, %v7045_v33  ;;  %v7899_v3 = vld [vmem:[#allocation37_spill] sm:$0xff] }
 0x525   : > { %v7121_v50 = vadd.f32 %v3300_v55, %v6918_v0  ;;  %v3301_v1 = vmax.f32 %v3295_v29, 0.0  ;;  %v7142_v0 = vmul.f32 %v7087_v16, %v7049_v25  ;;  %v7903_v16 = vld [vmem:[#allocation43_spill] sm:$0xff] }
 0x526   : > { %v7130_v47 = vadd.f32 %v3299_v17, %v6927_v58  ;;  %v5763_v58 = vcombine.low %v7078_v52, %v7091_v38 }
 0x527   : > { %v7145_v8 = vadd.f32 %v3301_v1, %v6942_v59  ;;  %v3542_v15 = vpop.f32.mrf.mxu0  ;;  %v3953_v59 = vmul.f32 %v7115_v28, %v7051_v14 }
 0x528   : > { %v3618_v10 = vmax.f32 %v3542_v15, 0.0  ;;  %v3613_v46 = vpop.f32.mrf.mxu1 }
 0x529   : > { %v3620_v26 = vmax.f32 %v3613_v46, 0.0  ;;  %v3544_v52 = vpop.f32.mrf.mxu0 }
 0x52a   : > { %v7170_v38 = vadd.f32 %v3618_v10, %v6971_v44  ;;  %v3619_v55 = vmax.f32 %v3544_v52, 0.0  ;;  %v3615_v35 = vpop.f32.mrf.mxu1  ;;  %v3634_v17 = vmul.f32 %v3618_v10, %v6871_v31  ;;  %v3638_v29 = vmul.f32 %v3618_v10, %v6878_v9  ;;  %v7892_v44 = vld [vmem:[#allocation16_spill] sm:$0xff]  ;;  %v7893_v52 = vld [vmem:[#allocation17_spill] sm:$0xff] }
 0x52b   : > { %v7175_v1 = vadd.f32 %v3620_v26, %v6976_v27  ;;  %v3621_v15 = vmax.f32 %v3615_v35, 0.0  ;;  %v3636_v46 = vmul.f32 %v3620_v26, %v6881_v56  ;;  %v3640_v31 = vmul.f32 %v3620_v26, %v7894_v60  ;;  %v7897_v27 = vld [vmem:[#allocation39_spill] sm:$0xff] }
 0x52c   : > { %7888 = vst [vmem:[#allocation10_spill] sm:$0xff] %v7170_v38  ;;  %v7181_v51 = vadd.f32 %v3619_v55, %v7890_v62  ;;  %v3635_v38 = vmul.f32 %v3619_v55, %v7892_v44  ;;  %v3639_v28 = vmul.f32 %v3619_v55, %v7893_v52  ;;  %v7898_v35 = vld [vmem:[#allocation27_spill] sm:$0xff]  ;;  %v5752_v56 = vcombine.low %v3634_v17, %v3638_v29 }
 0x52d   : > { %7889 = vst [vmem:[#allocation55_spill] sm:$0xff] %v7175_v1  ;;  %v7187_v9 = vadd.f32 %v3621_v15, %v7895_v42  ;;  %v3637_v1 = vmul.f32 %v3621_v15, %v7897_v27  ;;  %v3641_v41 = vmul.f32 %v3621_v15, %v7898_v35  ;;  %v3627_v7 = vmul.f32 %v3619_v55, %v7899_v3 }
 0x52e   : > { %7891 = vst [vmem:[#allocation46_spill] sm:$0xff] %v7181_v51  ;;  %v5753_v11 = vcombine.low %v3635_v38, %v3639_v28  ;;  %v3631_v62 = vmul.f32 %v3619_v55, %v7900_v36  ;;  %v7901_v51 = vld [vmem:[#allocation41_spill] sm:$0xff]  ;;  %v3633_v52 = vmul.f32 %v3621_v15, %v7902_v2  ;;  %v3626_v60 = vmul.f32 %v3618_v10, %v7903_v16 }
 0x52f   : > { %7896 = vst [vmem:[#allocation16_spill] sm:$0xff] %v7187_v9  ;;  %v3629_v24 = vmul.f32 %v3621_v15, %v7901_v51  ;;  %v5755_v44 = vcombine.low %v3637_v1, %v3641_v41  ;;  %v3630_v42 = vmul.f32 %v3618_v10, %v7904_v49  ;;  %v5754_v9 = vcombine.low %v3636_v46, %v3640_v31  ;;  %v647_v51 = vld [vmem:[%s7621_s4 + $0x30] sm:$0xff] }
 0x530   : > { %3710 = vmatprep.subr.mxu0 %v5753_v11  ;;  %v5749_v27 = vcombine.low %v3627_v7, %v3631_v62  ;;  %v3628_v35 = vmul.f32 %v3620_v26, %v7905_v22  ;;  %v3632_v28 = vmul.f32 %v3620_v26, %v6968_v37  ;;  %v3956_v41 = vmul.f32 %v7167_v39, %v7049_v25 }
 0x531   : > { %3781 = vmatprep.subr.mxu1 %v5755_v44  ;;  %3711 = vmatpush1.msra.mxu0 %v5752_v56  ;;  %v5751_v3 = vcombine.low %v3629_v24, %v3633_v52  ;;  %v5748_v36 = vcombine.low %v3626_v60, %v3630_v42  ;;  %v5765_v49 = vcombine.low %v7095_v48, %v7099_v30  ;;  %v5881_v30 = vmov 0  }
 0x532   : > { %3782 = vmatpush1.msra.mxu1 %v5754_v9  ;;  %3712 = vmatprep.subr.mxu0 %v5749_v27  ;;  %v5750_v2 = vcombine.low %v3628_v35, %v3632_v28  ;;  %v5762_v11 = vcombine.low %v7103_v12, %v7134_v23  ;;  %v5764_v37 = vcombine.low %v7138_v40, %v7142_v0  ;;  %v642_v12 = vld [vmem:[%s7621_s4 + $0x8] sm:$0xff]  ;;  %v649_v23 = vld [vmem:[%s7621_s4 + $0x40] sm:$0xff]  ;;  %v651_v40 = vld [vmem:[%s7621_s4 + $0x50] sm:$0xff] }
 0x533   : > { %3783 = vmatprep.subr.mxu1 %v5751_v3  ;;  %3713 = vmatpush1.msra.mxu0 %v5748_v36  ;;  %v5759_v24 = vcombine.low %v7151_v6, %v3955_v57  ;;  %v5761_v22 = vcombine.low %v3953_v59, %v3957_v63  ;;  %v5758_v16 = vcombine.low %v3950_v43, %v3954_v32  ;;  %v641_v0 = vld [vmem:[%s7621_s4] sm:$0xff] }
 0x534   : > { %3784 = vmatpush1.msra.mxu1 %v5750_v2  ;;  %5756 = vmatmul.mubr.msk.f32.vlgmr.msra.gmra.mxu0 %vm831_vm5, %v7013_v4  ;;  %v5760_v48 = vcombine.low %v3952_v13, %v3956_v41  ;;  %v643_v13 = vld [vmem:[%s7621_s4 + $0x10] sm:$0xff]  ;;  %v4363_v6 = vcombine.high %v7049_v25, %v7051_v14 }
 0x535   : > { %5757 = vmatmul.mubr.msk.f32.vlgmr.msra.gmra.mxu1 %vm831_vm5, %v7013_v4  ;;  %4034 = vmatprep.subr.mxu0 %v5763_v58  ;;  %v4362_v58 = vcombine.high %v7045_v33, %v7047_v34 }
 0x536   : > { %4105 = vmatprep.subr.mxu1 %v5765_v49  ;;  %4035 = vmatpush1.msra.mxu0 %v5762_v11  ;;  %v4377_v10 = vrot.slane %v4363_v6, %v6026_v5 }
 0x537   : > { %4106 = vmatpush1.msra.mxu1 %v5764_v37  ;;  %4036 = vmatprep.subr.mxu0 %v5759_v24  ;;  %v4370_v7 = vrot.slane %v4362_v58, %v6026_v5 }
 0x538   : > { %4107 = vmatprep.subr.mxu1 %v5761_v22  ;;  %4037 = vmatpush1.msra.mxu0 %v5758_v16 }
 0x539   : > { %4070 = vmatprep.mubr.f32.mxu0 %v7744_v53  ;;  %4108 = vmatpush1.msra.mxu1 %v5760_v48  ;;  %v4378_v57 = vcombine.low %v4370_v7, %v4377_v10  ;;  %v4379_v59 = vcombine.high %v4370_v7, %v4377_v10 }
 0x53a   : > { %4141 = vmatprep.mubr.f32.mxu1 %v7744_v53  ;;  %5766 = vmatmul.mubr.msk.f32.vlgmr.msra.gmra.mxu0 %vm831_vm5, %v7028_v61 }
 0x53b   : > { %5767 = vmatmul.mubr.msk.f32.vlgmr.msra.gmra.mxu1 %vm831_vm5, %v7028_v61  ;;  %4276 = vmatprep.mubr.f32.mxu0 %v7744_v53  ;;  %v4386_v63 = vrot.slane %v4378_v57, %v6026_v5  ;;  %v4393_v26 = vrot.slane %v4379_v59, %v6026_v5 }
 0x53c   : > { %4347 = vmatprep.mubr.f32.mxu1 %v7744_v53  ;;  %5868 = vset.pattern.permute.xlu1 %v5881_v30 }
 0x53d   : > { %5867 = vset.pattern.permute.xlu0 %v5881_v30  ;;  %4979 = vperm.xlu1 %5868, %v643_v13   ;;  %v4394_v43 = vcombine.high %v4386_v63, %v4386_v63  ;;  %v4395_v32 = vcombine.high %v4393_v26, %v4393_v26  ;;  %v7291_v3 = vrot.slane %v4386_v63, %v6038_v18 }
 0x53e   : > { %v7294_v36 = vrot.slane %v4393_v26, %v6038_v18  ;;  %v7300_v11 = vrot.slane %v4386_v63, %v6040_v19  ;;  %v7303_v37 = vrot.slane %v4393_v26, %v6040_v19  ;;  %v7309_v16 = vrot.slane %v4386_v63, %v6042_v20 }
 0x53f   : > { %v7247_v38 = vrot.slane %v4394_v43, %v6038_v18  ;;  %v7250_v55 = vrot.slane %v4395_v32, %v6038_v18  ;;  %v7253_v17 = vrot.slane %v4394_v43, %v6040_v19  ;;  %v7256_v29 = vrot.slane %v4395_v32, %v6040_v19  ;;  %7906 = vst [vmem:[#allocation17_spill] sm:$0xff] %v7291_v3 }
 0x540   : > { %v7259_v1 = vrot.slane %v4394_v43, %v6042_v20  ;;  %v7266_v31 = vrot.slane %v4395_v32, %v6042_v20  ;;  %v7269_v9 = vrot.slane %v4394_v43, %v6044_v21  ;;  %v7272_v56 = vrot.slane %v4395_v32, %v6044_v21  ;;  %7907 = vst [vmem:[#allocation36_spill] sm:$0xff] %v7294_v36 }
 0x541   : > { %4974 = vperm.xlu1 %5868, %v642_v12   ;;  %v7263_v46 = vmul.f32 %v7247_v38, %v7047_v34  ;;  %v7276_v52 = vmul.f32 %v7250_v55, %v7047_v34  ;;  %v7280_v60 = vmul.f32 %v7253_v17, %v7051_v14  ;;  %v7284_v42 = vmul.f32 %v7256_v29, %v7051_v14 }
 0x542   : > { %v7288_v28 = vmul.f32 %v7259_v1, %v7045_v33  ;;  %7908 = vst [vmem:[#allocation32_spill] sm:$0xff] %v7300_v11  ;;  %7909 = vst [vmem:[#allocation39_spill] sm:$0xff] %v7303_v37  ;;  %v7312_v18 = vrot.slane %v4393_v26, %v6042_v20  ;;  %v7319_v48 = vmul.f32 %v7266_v31, %v7045_v33 }
 0x543   : > { %7910 = vst [vmem:[#allocation27_spill] sm:$0xff] %v7309_v16  ;;  %v7323_v19 = vmul.f32 %v7269_v9, %v7049_v25  ;;  %v5783_v20 = vcombine.high %v7263_v46, %v7276_v52  ;;  %v7338_v12 = vrot.slane %v4393_v26, %v6044_v21  ;;  %v4483_v7 = vmul.f32 %v7303_v37, %v7051_v14  ;;  %v7914_v26 = vld [vmem:[#allocation30_spill] sm:$0xff]  ;;  %v7915_v46 = vld [vmem:[#allocation31_spill] sm:$0xff] }
 0x544   : > { %7911 = vst [vmem:[#allocation37_spill] sm:$0xff] %v7312_v18  ;;  %v4480_v10 = vmul.f32 %v7312_v18, %v7045_v33 }
 0x545   : > { %5210 = vperm.xlu1 %5868, %v647_v51   ;;  %7913 = vst [vmem:[#allocation41_spill] sm:$0xff] %v7338_v12 }
 0x549   : > { %5220 = vperm.xlu1 %5868, %v649_v23  }
 0x54d   : > { %5436 = vperm.xlu1 %5868, %v651_v40   ;;  %v4477_v40 = vmul.f32 %v7291_v3, %v7047_v34 }
 0x551   : > { %4890 = vperm.xlu1 %5868, %v641_v0   ;;  %v4479_v0 = vmul.f32 %v7300_v11, %v7051_v14  ;;  %v7927_v11 = vld [vmem:[#allocation9_spill] sm:$0xff] }
 0x5f4   : > { %v3748_v15 = vpop.f32.mrf.mxu0 }
 0x5f5   : > { %v3824_v62 = vmax.f32 %v3748_v15, 0.0  ;;  %v3819_v44 = vpop.f32.mrf.mxu1 }
 0x5f6   : > { %v3826_v27 = vmax.f32 %v3819_v44, 0.0  ;;  %v3750_v35 = vpop.f32.mrf.mxu0  ;;  %v7916_v44 = vld [vmem:[#allocation47_spill] sm:$0xff] }
 0x5f7   : > { %v7297_v41 = vadd.f32 %v3824_v62, %v7112_v54  ;;  %v3825_v2 = vmax.f32 %v3750_v35, 0.0  ;;  %v3821_v49 = vpop.f32.mrf.mxu1  ;;  %v7917_v35 = vld [vmem:[#allocation24_spill] sm:$0xff] }
 0x5f8   : > { %v7306_v24 = vadd.f32 %v3826_v27, %v7121_v50  ;;  %v3827_v22 = vmax.f32 %v3821_v49, 0.0  ;;  %v7326_v50 = vrot.slane %v4386_v63, %v6044_v21  ;;  %v4476_v21 = vmul.f32 %v7309_v16, %v7045_v33  ;;  %v7918_v49 = vld [vmem:[#allocation25_spill] sm:$0xff]  ;;  %v7922_v33 = vld [vmem:[#allocation26_spill] sm:$0xff] }
 0x5f9   : > { %v7315_v54 = vadd.f32 %v3825_v2, %v7130_v47  ;;  %v7335_v47 = vmul.f32 %v7272_v56, %v7049_v25  ;;  %v4482_v27 = vmul.f32 %v7338_v12, %v7049_v25  ;;  %v7925_v16 = vld [vmem:[#allocation50_spill] sm:$0xff]  ;;  %v7926_v12 = vld [vmem:[#allocation51_spill] sm:$0xff] }
 0x5fa   : > { %7912 = vst [vmem:[#allocation40_spill] sm:$0xff] %v7326_v50  ;;  %v7329_v13 = vadd.f32 %v3827_v22, %v7145_v8  ;;  %v4072_v30 = vpop.f32.mrf.mxu0  ;;  %v4481_v8 = vmul.f32 %v7294_v36, %v7047_v34  ;;  %v4478_v32 = vmul.f32 %v7326_v50, %v7049_v25  ;;  %v7928_v36 = vld [vmem:[#allocation10_spill] sm:$0xff] }
 0x5fb   : > { %v4148_v51 = vmax.f32 %v4072_v30, 0.0  ;;  %v4143_v23 = vpop.f32.mrf.mxu1  ;;  %v7919_v30 = vld [vmem:[#allocation48_spill] sm:$0xff] }
 0x5fc   : > { %v4150_v58 = vmax.f32 %v4143_v23, 0.0  ;;  %v4074_v6 = vpop.f32.mrf.mxu0 }
 0x5fd   : > { %v4149_v57 = vmax.f32 %v4074_v6, 0.0  ;;  %v4145_v59 = vpop.f32.mrf.mxu1  ;;  %v4164_v63 = vmul.f32 %v4148_v51, %v7074_v45  ;;  %v4168_v43 = vmul.f32 %v4148_v51, %v7914_v26  ;;  %v7920_v45 = vld [vmem:[#allocation52_spill] sm:$0xff]  ;;  %v7921_v26 = vld [vmem:[#allocation35_spill] sm:$0xff] }
 0x5fe   : > { %v4151_v15 = vmax.f32 %v4145_v59, 0.0  ;;  %v4166_v62 = vmul.f32 %v4150_v58, %v7915_v46  ;;  %v4170_v52 = vmul.f32 %v4150_v58, %v7916_v44  ;;  %v4156_v6 = vmul.f32 %v4148_v51, %v7920_v45  ;;  %v7923_v59 = vld [vmem:[#allocation49_spill] sm:$0xff] }
 0x5ff   : > { %v4165_v2 = vmul.f32 %v4149_v57, %v7917_v35  ;;  %v4169_v22 = vmul.f32 %v4149_v57, %v7918_v49  ;;  %v4157_v23 = vmul.f32 %v4149_v57, %v7919_v30  ;;  %v4161_v34 = vmul.f32 %v4149_v57, %v7923_v59  ;;  %v7924_v46 = vld [vmem:[#allocation53_spill] sm:$0xff]  ;;  %v7929_v59 = vld [vmem:[#allocation46_spill] sm:$0xff] }
 0x600   : > { %v4167_v5 = vmul.f32 %v4151_v15, %v7921_v26  ;;  %v4171_v14 = vmul.f32 %v4151_v15, %v7922_v33  ;;  %v4160_v50 = vmul.f32 %v4148_v51, %v7924_v46  ;;  %v5772_v18 = vcombine.low %v4164_v63, %v4168_v43 }
 0x601   : > { %v5773_v44 = vcombine.low %v4165_v2, %v4169_v22  ;;  %v4159_v25 = vmul.f32 %v4151_v15, %v7925_v16  ;;  %v4163_v35 = vmul.f32 %v4151_v15, %v7926_v12  ;;  %v5774_v49 = vcombine.low %v4166_v62, %v4170_v52  ;;  %v7930_v2 = vld [vmem:[#allocation55_spill] sm:$0xff] }
 0x602   : > { %v5775_v37 = vcombine.low %v4167_v5, %v4171_v14  ;;  %v4158_v30 = vmul.f32 %v4150_v58, %v7927_v11  ;;  %v4162_v45 = vmul.f32 %v4150_v58, %v7167_v39  ;;  %v5769_v26 = vcombine.low %v4157_v23, %v4161_v34  ;;  %v7931_v14 = vld [vmem:[#allocation16_spill] sm:$0xff] }
 0x603   : > { %4240 = vmatprep.subr.mxu0 %v5773_v44  ;;  %v7373_v33 = vadd.f32 %v4148_v51, %v7928_v36  ;;  %v7376_v3 = vadd.f32 %v4149_v57, %v7929_v59  ;;  %v7379_v63 = vadd.f32 %v4150_v58, %v7930_v2  ;;  %v5771_v16 = vcombine.low %v4159_v25, %v4163_v35 }
 0x604   : > { %4311 = vmatprep.subr.mxu1 %v5775_v37  ;;  %4241 = vmatpush1.msra.mxu0 %v5772_v18  ;;  %v5768_v5 = vcombine.low %v4156_v6, %v4160_v50  ;;  %v7382_v12 = vadd.f32 %v4151_v15, %v7931_v14  ;;  %v5770_v39 = vcombine.low %v4158_v30, %v4162_v45  ;;  %v650_v50 = vld [vmem:[%s7621_s4 + $0x48] sm:$0xff]  ;;  %v7935_v14 = vld [vmem:[#allocation39_spill] sm:$0xff] }
 0x605   : > { %4312 = vmatpush1.msra.mxu1 %v5774_v49  ;;  %4242 = vmatprep.subr.mxu0 %v5769_v26  ;;  %v5785_v34 = vcombine.high %v7280_v60, %v7284_v42  ;;  %v5782_v36 = vcombine.high %v7288_v28, %v7319_v48  ;;  %v5784_v11 = vcombine.high %v7323_v19, %v7335_v47  ;;  %v645_v42 = vld [vmem:[%s7621_s4 + $0x20] sm:$0xff]  ;;  %v644_v28 = vld [vmem:[%s7621_s4 + $0x18] sm:$0xff]  ;;  %v654_v48 = vld [vmem:[%s7621_s4 + $0x68] sm:$0x1] }
 0x606   : > { %4313 = vmatprep.subr.mxu1 %v5771_v16  ;;  %4243 = vmatpush1.msra.mxu0 %v5768_v5  ;;  %v5779_v37 = vcombine.high %v4477_v40, %v4481_v8  ;;  %v5781_v25 = vcombine.high %v4479_v0, %v4483_v7  ;;  %v5778_v18 = vcombine.high %v4476_v21, %v4480_v10  ;;  %v648_v19 = vld [vmem:[%s7621_s4 + $0x38] sm:$0xff]  ;;  %v653_v47 = vld [vmem:[%s7621_s4 + $0x60] sm:$0xff] }
 0x607   : > { %4314 = vmatpush1.msra.mxu1 %v5770_v39  ;;  %5776 = vmatmul.mubr.msk.f32.vlgmr.msra.gmra.mxu0 %vm831_vm5, %v7013_v4  ;;  %v5780_v60 = vcombine.high %v4478_v32, %v4482_v27 }
 0x608   : > { %5777 = vmatmul.mubr.msk.f32.vlgmr.msra.gmra.mxu1 %vm831_vm5, %v7013_v4  ;;  %4560 = vmatprep.subr.mxu0 %v5783_v20  ;;  %v652_v20 = vld [vmem:[%s7621_s4 + $0x58] sm:$0xff] }
 0x609   : > { %4631 = vmatprep.subr.mxu1 %v5785_v34  ;;  %4561 = vmatpush1.msra.mxu0 %v5782_v36  ;;  %v7937_v36 = vld [vmem:[#allocation37_spill] sm:$0xff] }
 0x60a   : > { %4632 = vmatpush1.msra.mxu1 %v5784_v11  ;;  %4562 = vmatprep.subr.mxu0 %v5779_v37  ;;  %v7938_v37 = vld [vmem:[#allocation40_spill] sm:$0xff] }
 0x60b   : > { %4633 = vmatprep.subr.mxu1 %v5781_v25  ;;  %4563 = vmatpush1.msra.mxu0 %v5778_v18  ;;  %v7939_v18 = vld [vmem:[#allocation41_spill] sm:$0xff] }
 0x60c   : > { %4596 = vmatprep.mubr.f32.mxu0 %v7744_v53  ;;  %4634 = vmatpush1.msra.mxu1 %v5780_v60 }
 0x60d   : > { %4667 = vmatprep.mubr.f32.mxu1 %v7744_v53  ;;  %5786 = vmatmul.mubr.msk.f32.vlgmr.msra.gmra.mxu0 %vm831_vm5, %v7028_v61 }
 0x60e   : > { %5787 = vmatmul.mubr.msk.f32.vlgmr.msra.gmra.mxu1 %vm831_vm5, %v7028_v61  ;;  %4802 = vmatprep.mubr.f32.mxu0 %v7744_v53  ;;  %v646_v61 = vld [vmem:[%s7621_s4 + $0x28] sm:$0xff] }
 0x60f   : > { %4873 = vmatprep.mubr.f32.mxu1 %v7744_v53  ;;  %4989 = vperm.xlu0 %5867, %v645_v42  }
 0x610   : > { %5503 = vperm.xlu1 %5868, %v654_v48   ;;  %v7940_v48 = vld [vmem:[#allocation54_spill] sm:$0xff] }
 0x613   : > { %4984 = vperm.xlu0 %5867, %v644_v28  }
 0x617   : > { %5205 = vperm.xlu0 %5867, %v646_v61   ;;  %v7941_v61 = vld [vmem:[#allocation38_spill] sm:$0xff] }
 0x61b   : > { %5215 = vperm.xlu0 %5867, %v648_v19   ;;  %v7942_v19 = vld [vmem:[#allocation33_spill] sm:$0xff] }
 0x61f   : > { %5431 = vperm.xlu0 %5867, %v650_v50   ;;  %v7943_v50 = vld [vmem:[#allocation34_spill] sm:$0xff] }
 0x623   : > { %5441 = vperm.xlu0 %5867, %v652_v20   ;;  %v7944_v20 = vld [vmem:[#allocation22_spill] sm:$0xff] }
 0x627   : > { %5446 = vperm.xlu0 %5867, %v653_v47   ;;  %v7945_v47 = vld [vmem:[#allocation29_spill] sm:$0xff] }
 0x6c7   : > { %v4278_v51 = vpop.f32.mrf.mxu0 }
 0x6c8   : > { %v4354_v40 = vmax.f32 %v4278_v51, 0.0  ;;  %v4349_v8 = vpop.f32.mrf.mxu1  ;;  %v7946_v51 = vld [vmem:[#allocation28_spill] sm:$0xff] }
 0x6c9   : > { %v4356_v0 = vmax.f32 %v4349_v8, 0.0  ;;  %v4280_v58 = vpop.f32.mrf.mxu0  ;;  %v7948_v8 = vld [vmem:[#allocation19_spill] sm:$0xff] }
 0x6ca   : > { %v7427_v7 = vadd.f32 %v4354_v40, %v7297_v41  ;;  %v4355_v21 = vmax.f32 %v4280_v58, 0.0  ;;  %v4351_v10 = vpop.f32.mrf.mxu1  ;;  %v7947_v40 = vld [vmem:[#allocation23_spill] sm:$0xff]  ;;  %v7951_v58 = vld [vmem:[#allocation20_spill] sm:$0xff] }
 0x6cb   : > { %v7430_v57 = vadd.f32 %v4356_v0, %v7306_v24  ;;  %v4357_v43 = vmax.f32 %v4351_v10, 0.0  ;;  %v7949_v0 = vld [vmem:[#allocation21_spill] sm:$0xff]  ;;  %v4968_v10 = vld [vmem:[%s7619_s2] sm:$0xff] }
 0x6cc   : > { %v7433_v32 = vadd.f32 %v4355_v21, %v7315_v54  ;;  %v7952_v21 = vld [vmem:[#allocation12_spill] sm:$0xff] }
 0x6cd   : > { %v7436_v15 = vadd.f32 %v4357_v43, %v7329_v13  ;;  %v4598_v62 = vpop.f32.mrf.mxu0  ;;  %v7953_v43 = vld [vmem:[#allocation15_spill] sm:$0xff] }
 0x6ce   : > { %v4674_v52 = vmax.f32 %v4598_v62, 0.0  ;;  %v4669_v27 = vpop.f32.mrf.mxu1  ;;  %v7954_v62 = vld [vmem:[#allocation11_spill] sm:$0xff] }
 0x6cf   : > { %v4676_v22 = vmax.f32 %v4669_v27, 0.0  ;;  %v4600_v23 = vpop.f32.mrf.mxu0  ;;  %v4969_v27 = vld [vmem:[%s7619_s2 + $0x8] sm:$0xff] }
 0x6d0   : > { %v4675_v6 = vmax.f32 %v4600_v23, 0.0  ;;  %v4671_v41 = vpop.f32.mrf.mxu1  ;;  %v7439_v46 = vadd.f32 %v4674_v52, %v7373_v33  ;;  %v4690_v24 = vmul.f32 %v4674_v52, %v7259_v1  ;;  %v4694_v54 = vmul.f32 %v4674_v52, %v7266_v31  ;;  %v4971_v23 = vld [vmem:[%s7619_s2 + $0x18] sm:$0xff] }
 0x6d1   : > { %v4677_v44 = vmax.f32 %v4671_v41, 0.0  ;;  %v7443_v35 = vadd.f32 %v4676_v22, %v7379_v63  ;;  %v4692_v13 = vmul.f32 %v4676_v22, %v7269_v9  ;;  %v4696_v26 = vmul.f32 %v4676_v22, %v7272_v56  ;;  %v7934_v56 = vld [vmem:[#allocation32_spill] sm:$0xff] }
 0x6d2   : > { %v7448_v49 = vadd.f32 %v4675_v6, %v7376_v3  ;;  %v4691_v30 = vmul.f32 %v4675_v6, %v7247_v38  ;;  %v4695_v45 = vmul.f32 %v4675_v6, %v7250_v55  ;;  %v5792_v63 = vcombine.low %v4690_v24, %v4694_v54  ;;  %v7932_v3 = vld [vmem:[#allocation17_spill] sm:$0xff]  ;;  %v7933_v38 = vld [vmem:[#allocation36_spill] sm:$0xff] }
 0x6d3   : > { %v7454_v33 = vadd.f32 %v4677_v44, %v7382_v12  ;;  %v4693_v1 = vmul.f32 %v4677_v44, %v7253_v17  ;;  %v4697_v59 = vmul.f32 %v4677_v44, %v7256_v29  ;;  %v5794_v9 = vcombine.low %v4692_v13, %v4696_v26  ;;  %v7936_v17 = vld [vmem:[#allocation27_spill] sm:$0xff] }
 0x6d4   : > { %v5793_v2 = vcombine.low %v4691_v30, %v4695_v45  ;;  %v4683_v16 = vmul.f32 %v4675_v6, %v7932_v3  ;;  %v4687_v55 = vmul.f32 %v4675_v6, %v7933_v38  ;;  %v4685_v5 = vmul.f32 %v4677_v44, %v7934_v56  ;;  %v7516_v6 = vpop.permute.xlu1 %4979 }
 0x6d5   : > { %v5795_v31 = vcombine.low %v4693_v1, %v4697_v59  ;;  %v4689_v12 = vmul.f32 %v4677_v44, %v7935_v14  ;;  %v4682_v34 = vmul.f32 %v4674_v52, %v7936_v17  ;;  %v4686_v11 = vmul.f32 %v4674_v52, %v7937_v36  ;;  %v7955_v52 = vld [vmem:[#allocation14_spill] sm:$0xff] }
 0x6d6   : > { %4766 = vmatprep.subr.mxu0 %v5793_v2  ;;  %v5789_v39 = vcombine.low %v4683_v16, %v4687_v55  ;;  %v4684_v25 = vmul.f32 %v4676_v22, %v7938_v37  ;;  %v4688_v60 = vmul.f32 %v4676_v22, %v7939_v18  ;;  %v4970_v22 = vld [vmem:[%s7619_s2 + $0x10] sm:$0xff] }
 0x6d7   : > { %4837 = vmatprep.subr.mxu1 %v5795_v31  ;;  %4767 = vmatpush1.msra.mxu0 %v5792_v63  ;;  %v5791_v29 = vcombine.low %v4685_v5, %v4689_v12  ;;  %v5788_v42 = vcombine.low %v4682_v34, %v4686_v11 }
 0x6d8   : > { %4838 = vmatpush1.msra.mxu1 %v5794_v9  ;;  %4768 = vmatprep.subr.mxu0 %v5789_v39  ;;  %v5790_v28 = vcombine.low %v4684_v25, %v4688_v60  ;;  %v7518_v41 = vpop.permute.xlu1 %4974 }
 0x6d9   : > { %4839 = vmatprep.subr.mxu1 %v5791_v29  ;;  %4769 = vmatpush1.msra.mxu0 %v5788_v42 }
 0x6da   : > { %4840 = vmatpush1.msra.mxu1 %v5790_v28  ;;  %5796 = vmatmul.mubr.msk.f32.vlgmr.msra.gmra.mxu0 %vm831_vm5, %v7013_v4 }
 0x6db   : > { %5797 = vmatmul.mubr.msk.f32.vlgmr.msra.gmra.mxu1 %vm831_vm5, %v7013_v4  ;;  %5029 = vmatprep.subr.mxu0 %v7940_v48  ;;  %v7950_v4 = vld [vmem:[#allocation18_spill] sm:$0xff] }
 0x6dc   : > { %5118 = vmatprep.subr.mxu1 %v7941_v61  ;;  %5030 = vmatpush1.msra.mxu0 %v7942_v19  ;;  %v7520_v24 = vpop.permute.xlu1 %5210 }
 0x6dd   : > { %5119 = vmatpush1.msra.mxu1 %v7943_v50  ;;  %5031 = vmatprep.subr.mxu0 %v7944_v20 }
 0x6de   : > { %5120 = vmatprep.subr.mxu1 %v7945_v47  ;;  %5032 = vmatpush1.msra.mxu0 %v7946_v51 }
 0x6df   : > { %5121 = vmatpush1.msra.mxu1 %v7947_v40  ;;  %5033 = vmatprep.subr.mxu0 %v7948_v8 }
 0x6e0   : > { %5122 = vmatprep.subr.mxu1 %v7949_v0  ;;  %5034 = vmatpush1.msra.mxu0 %v7950_v4  ;;  %v7522_v44 = vpop.permute.xlu1 %5220 }
 0x6e1   : > { %5123 = vmatpush1.msra.mxu1 %v7951_v58  ;;  %5035 = vmatprep.subr.mxu0 %v7952_v21 }
 0x6e2   : > { %5124 = vmatprep.subr.mxu1 %v7953_v43  ;;  %5036 = vmatpush1.msra.mxu0 %v7954_v62 }
 0x6e3   : > { %5069 = vmatprep.mubr.f32.mxu0 %v7744_v53  ;;  %5125 = vmatpush1.msra.mxu1 %v7955_v52 }
 0x6e4   : > { %5158 = vmatprep.mubr.f32.mxu1 %v7744_v53  ;;  %5798 = vmatmul.mubr.msk.f32.vlgmr.msra.gmra.mxu0 %vm4992_vm6, %v4968_v10  ;;  %v7524_v54 = vpop.permute.xlu1 %5436 }
 0x6e5   : > { %5802 = vmatmul.mubr.msk.f32.vlgmr.msra.gmra.mxu1 %vm4992_vm6, %v4968_v10  ;;  %5075 = vmatprep.mubr.f32.mxu0 %v7744_v53 }
 0x6e6   : > { %5164 = vmatprep.mubr.f32.mxu1 %v7744_v53 }
 0x6e8   : > { %5799 = vmatmul.mubr.msk.f32.gmra.mxu0 %vm4992_vm6, %v4969_v27  ;;  %v4891_v13 = vpop.permute.xlu1 %4890 }
 0x6e9   : > { %5803 = vmatmul.mubr.msk.f32.gmra.mxu1 %vm4992_vm6, %v4969_v27  ;;  %5081 = vmatprep.mubr.f32.mxu0 %v7744_v53  ;;  %v4893_v30 = vmul.f32 %v4891_v13, %v7439_v46  ;;  %v4895_v45 = vmul.f32 %v4891_v13, %v7443_v35  ;;  %v4894_v26 = vmul.f32 %v4891_v13, %v7448_v49  ;;  %v4930_v55 = vrot.slane %v4891_v13, 4 }
 0x6ea   : > { %5170 = vmatprep.mubr.f32.mxu1 %v7744_v53  ;;  %v4896_v1 = vmul.f32 %v4891_v13, %v7454_v33 }
 0x6eb   : > { %v4898_v59 = vsel %vm4897_vm7, %v4893_v30, 0.0  ;;  %v4912_v2 = vsel %vm4897_vm7, %v4895_v45, 0.0  ;;  %v4905_v31 = vsel %vm4897_vm7, %v4894_v26, 0.0 }
 0x6ec   : > { %5800 = vmatmul.mubr.msk.f32.gmra.mxu0 %vm4992_vm6, %v4970_v22  ;;  %v4899_v63 = vrot.slane %v4898_v59, 4  ;;  %v4919_v9 = vsel %vm4897_vm7, %v4896_v1, 0.0  ;;  %v4913_v3 = vrot.slane %v4912_v2, 4  ;;  %v4906_v16 = vrot.slane %v4905_v31, 4 }
 0x6ed   : > { %5804 = vmatmul.mubr.msk.f32.gmra.mxu1 %vm4992_vm6, %v4970_v22  ;;  %5087 = vmatprep.mubr.f32.mxu0 %v7744_v53  ;;  %v4920_v46 = vrot.slane %v4919_v9, 4 }
 0x6ee   : > { %5176 = vmatprep.mubr.f32.mxu1 %v7744_v53  ;;  %v4900_v5 = vadd.f32 %v4899_v63, %v4898_v59  ;;  %v4914_v33 = vadd.f32 %v4913_v3, %v4912_v2  ;;  %v4907_v34 = vadd.f32 %v4906_v16, %v4905_v31 }
 0x6ef   : > { %v4921_v11 = vadd.f32 %v4920_v46, %v4919_v9 }
 0x6f0   : > { %5801 = vmatmul.mubr.msk.f32.gmra.mxu0 %vm4992_vm6, %v4971_v23  ;;  %v4901_v18 = vrot.slane %v4900_v5, 2  ;;  %v4915_v28 = vrot.slane %v4914_v33, 2  ;;  %v4908_v19 = vrot.slane %v4907_v34, 2 }
 0x6f1   : > { %5805 = vmatmul.mubr.msk.f32.gmra.mxu1 %vm4992_vm6, %v4971_v23  ;;  %5299 = vmatprep.mubr.f32.mxu0 %v7744_v53  ;;  %v4922_v47 = vrot.slane %v4921_v11, 2 }
 0x6f2   : > { %5388 = vmatprep.mubr.f32.mxu1 %v7744_v53  ;;  %v4902_v40 = vadd.f32 %v4901_v18, %v4900_v5  ;;  %v4909_v43 = vadd.f32 %v4908_v19, %v4907_v34 }
 0x6f3   : > { %v4923_v22 = vadd.f32 %v4922_v47, %v4921_v11 }
 0x6f4   : > { %v4903_v45 = vrot.slane %v4902_v40, 1  ;;  %v4910_v3 = vrot.slane %v4909_v43, 1 }
 0x79a   : > { %v4804_v38 = vpop.f32.mrf.mxu0 }
 0x79b   : > { %v4880_v56 = vmax.f32 %v4804_v38, 0.0  ;;  %v4875_v35 = vpop.f32.mrf.mxu1 }
 0x79c   : > { %v4882_v49 = vmax.f32 %v4875_v35, 0.0  ;;  %v4806_v14 = vpop.f32.mrf.mxu0 }
 0x79d   : > { %v4884_v12 = vadd.f32 %v4880_v56, %v7427_v7  ;;  %v4881_v39 = vmax.f32 %v4806_v14, 0.0  ;;  %v4877_v17 = vpop.f32.mrf.mxu1  ;;  %v4904_v14 = vadd.f32 %v4903_v45, %v4902_v40 }
 0x79e   : > { %v4886_v29 = vadd.f32 %v4882_v49, %v7430_v57  ;;  %v4883_v36 = vmax.f32 %v4877_v17, 0.0  ;;  %v4990_v49 = vpop.permute.xlu0 %4989 }
 0x79f   : > { %v4932_v37 = vmul.f32 %v4930_v55, %v4884_v12  ;;  %v4885_v25 = vadd.f32 %v4881_v39, %v7433_v32 }
 0x7a0   : > { %v4934_v60 = vmul.f32 %v4930_v55, %v4886_v29  ;;  %v4887_v42 = vadd.f32 %v4883_v36, %v7436_v15  ;;  %v4916_v15 = vadd.f32 %v4915_v28, %v4914_v33 }
 0x7a1   : > { %v4936_v48 = vsel %vm4897_vm7, %v4932_v37, 0.0  ;;  %v4933_v61 = vmul.f32 %v4930_v55, %v4885_v25  ;;  %v4911_v37 = vadd.f32 %v4910_v3, %v4909_v43 }
 0x7a2   : > { %v4937_v7 = vrot.slane %v4936_v48, 4  ;;  %v4950_v50 = vsel %vm4897_vm7, %v4934_v60, 0.0  ;;  %v4935_v20 = vmul.f32 %v4930_v55, %v4887_v42  ;;  %v4917_v2 = vrot.slane %v4916_v15, 1 }
 0x7a3   : > { %v4951_v57 = vrot.slane %v4950_v50, 4  ;;  %v4943_v51 = vsel %vm4897_vm7, %v4933_v61, 0.0  ;;  %v4924_v55 = vrot.slane %v4923_v22, 1 }
 0x7a4   : > { %v4938_v8 = vadd.f32 %v4937_v7, %v4936_v48  ;;  %v4944_v32 = vrot.slane %v4943_v51, 4  ;;  %v4957_v0 = vsel %vm4897_vm7, %v4935_v20, 0.0  ;;  %v7542_v4 = vpop.f32.mrf.mxu0  ;;  %v4918_v17 = vadd.f32 %v4917_v2, %v4916_v15  ;;  %v4985_v20 = vpop.permute.xlu0 %4984 }
 0x7a5   : > { %v4952_v58 = vadd.f32 %v4951_v57, %v4950_v50  ;;  %v4958_v21 = vrot.slane %v4957_v0, 4  ;;  %v7544_v10 = vpop.f32.mrf.mxu1  ;;  %v4925_v42 = vadd.f32 %v4924_v55, %v4923_v22 }
 0x7a6   : > { %v4939_v62 = vrot.slane %v4938_v8, 2  ;;  %v4945_v52 = vadd.f32 %v4944_v32, %v4943_v51  ;;  %v5073_v27 = vpop.f32.mrf.mxu0 }
 0x7a7   : > { %v4953_v23 = vrot.slane %v4952_v58, 2  ;;  %v4959_v13 = vadd.f32 %v4958_v21, %v4957_v0  ;;  %v5162_v30 = vpop.f32.mrf.mxu1  ;;  %v5074_v45 = vadd.f32 %v5073_v27, %v7518_v41 }
 0x7a8   : > { %v4940_v26 = vadd.f32 %v4939_v62, %v4938_v8  ;;  %v4946_v1 = vrot.slane %v4945_v52, 2  ;;  %v5077_v59 = vpop.f32.mrf.mxu0 }
 0x7a9   : > { %v4954_v31 = vadd.f32 %v4953_v23, %v4952_v58  ;;  %v4960_v63 = vrot.slane %v4959_v13, 2  ;;  %v5166_v9 = vpop.f32.mrf.mxu1 }
 0x7aa   : > { %v4941_v16 = vrot.slane %v4940_v26, 1  ;;  %v4947_v38 = vadd.f32 %v4946_v1, %v4945_v52  ;;  %v5079_v46 = vpop.f32.mrf.mxu0  ;;  %v5078_v52 = vadd.f32 %v5077_v59, %v7516_v6  ;;  %v5161_v59 = vadd.f32 %v7544_v10, %v7518_v41 }
 0x7ab   : > { %v4955_v56 = vrot.slane %v4954_v31, 1  ;;  %v4961_v35 = vadd.f32 %v4960_v63, %v4959_v13  ;;  %v5168_v5 = vpop.f32.mrf.mxu1  ;;  %v5080_v21 = vadd.f32 %v5079_v46, %v7516_v6  ;;  %v5163_v63 = vadd.f32 %v5162_v30, %v7518_v41 }
 0x7ac   : > { %v4942_v33 = vadd.f32 %v4941_v16, %v4940_v26  ;;  %v4948_v12 = vrot.slane %v4947_v38, 1  ;;  %v5083_v39 = vpop.f32.mrf.mxu0  ;;  %v5169_v22 = vadd.f32 %v5168_v5, %v7516_v6  ;;  %v5167_v26 = vadd.f32 %v5166_v9, %v7516_v6  ;;  %v5202_v5 = vld [vmem:[%s7620_s3 + $0x18] sm:$0xff] }
 0x7ad   : > { %v4956_v34 = vadd.f32 %v4955_v56, %v4954_v31  ;;  %v4962_v29 = vrot.slane %v4961_v35, 1  ;;  %v5172_v36 = vpop.f32.mrf.mxu1  ;;  %v5084_v0 = vadd.f32 %v5083_v39, %v4985_v20  ;;  %v5072_v31 = vadd.f32 %v7542_v4, %v7518_v41  ;;  %v5199_v41 = vld [vmem:[%s7620_s3] sm:$0xff]  ;;  %v5200_v56 = vld [vmem:[%s7620_s3 + $0x8] sm:$0xff] }
 0x7ae   : > { %v7546_v11 = vadd.f32 %v4942_v33, %v4904_v14  ;;  %v4949_v25 = vadd.f32 %v4948_v12, %v4947_v38  ;;  %v5085_v18 = vpop.f32.mrf.mxu0  ;;  %v5173_v43 = vadd.f32 %v5172_v36, %v4985_v20  ;;  %v5188_v38 = vmax.f32 %v5080_v21, 0.0 }
 0x7af   : > { %v7548_v60 = vadd.f32 %v4956_v34, %v4918_v17  ;;  %v4963_v28 = vadd.f32 %v4962_v29, %v4961_v35  ;;  %v5174_v48 = vpop.f32.mrf.mxu1  ;;  %v5086_v51 = vadd.f32 %v5085_v18, %v4985_v20  ;;  %v5191_v3 = vmax.f32 %v5084_v0, 0.0  ;;  %v5201_v35 = vld [vmem:[%s7620_s3 + $0x10] sm:$0xff] }
 0x7b0   : > { %v7550_v61 = vadd.f32 %v4949_v25, %v4911_v37  ;;  %v5089_v19 = vpop.f32.mrf.mxu0  ;;  %v5175_v15 = vadd.f32 %v5174_v48, %v4985_v20  ;;  %v5193_v46 = vmax.f32 %v5173_v43, 0.0  ;;  %v5187_v6 = vmax.f32 %v5078_v52, 0.0 }
 0x7b1   : > { %v7552_v7 = vadd.f32 %v4963_v28, %v4925_v42  ;;  %v5178_v50 = vpop.f32.mrf.mxu1  ;;  %v5090_v47 = vadd.f32 %v5089_v19, %v4990_v49  ;;  %v5192_v1 = vmax.f32 %v5086_v51, 0.0  ;;  %v5190_v27 = vmax.f32 %v5169_v22, 0.0 }
 0x7b2   : > { %v5091_v57 = vpop.f32.mrf.mxu0  ;;  %v5179_v40 = vadd.f32 %v5178_v50, %v4990_v49  ;;  %v5194_v16 = vmax.f32 %v5175_v15, 0.0  ;;  %v5184_v9 = vmax.f32 %v5074_v45, 0.0  ;;  %v5189_v55 = vmax.f32 %v5167_v26, 0.0 }
 0x7b3   : > { %v5092_v8 = vadd.f32 %v5091_v57, %v4990_v49  ;;  %v5180_v32 = vpop.f32.mrf.mxu1  ;;  %v5195_v23 = vmax.f32 %v5090_v47, 0.0  ;;  %v5183_v4 = vmax.f32 %v5072_v31, 0.0  ;;  %v5186_v30 = vmax.f32 %v5163_v63, 0.0 }
 0x7b4   : > { %v5181_v58 = vadd.f32 %v5180_v32, %v4990_v49  ;;  %v5197_v2 = vmax.f32 %v5179_v40, 0.0  ;;  %v5185_v10 = vmax.f32 %v5161_v59, 0.0  ;;  %v5206_v49 = vpop.permute.xlu0 %5205 }
 0x7b5   : > { %v5196_v62 = vmax.f32 %v5092_v8, 0.0 }
 0x7b6   : > { %v5198_v13 = vmax.f32 %v5181_v58, 0.0 }
 0x7b7   : > { %5259 = vmatprep.subr.mxu0 %v5196_v62 }
 0x7b8   : > { %5348 = vmatprep.subr.mxu1 %v5198_v13  ;;  %5260 = vmatpush1.msra.mxu0 %v5195_v23  ;;  %v5216_v14 = vpop.permute.xlu0 %5215 }
 0x7b9   : > { %5349 = vmatpush1.msra.mxu1 %v5197_v2  ;;  %5261 = vmatprep.subr.mxu0 %v5192_v1 }
 0x7ba   : > { %5350 = vmatprep.subr.mxu1 %v5194_v16  ;;  %5262 = vmatpush1.msra.mxu0 %v5191_v3 }
 0x7bb   : > { %5351 = vmatpush1.msra.mxu1 %v5193_v46  ;;  %5263 = vmatprep.subr.mxu0 %v5188_v38 }
 0x7bc   : > { %5352 = vmatprep.subr.mxu1 %v5190_v27  ;;  %5264 = vmatpush1.msra.mxu0 %v5187_v6  ;;  %v5432_v37 = vpop.permute.xlu0 %5431 }
 0x7bd   : > { %5353 = vmatpush1.msra.mxu1 %v5189_v55  ;;  %5265 = vmatprep.subr.mxu0 %v5184_v9 }
 0x7be   : > { %5354 = vmatprep.subr.mxu1 %v5186_v30  ;;  %5266 = vmatpush1.msra.mxu0 %v5183_v4 }
 0x7bf   : > { %5355 = vmatpush1.msra.mxu1 %v5185_v10  ;;  %5806 = vmatmul.mubr.msk.f32.vlgmr.msra.gmra.mxu0 %vm4992_vm6, %v5199_v41 }
 0x7c0   : > { %5810 = vmatmul.mubr.msk.f32.vlgmr.msra.gmra.mxu1 %vm4992_vm6, %v5199_v41  ;;  %5305 = vmatprep.mubr.f32.mxu0 %v7744_v53  ;;  %v5442_v43 = vpop.permute.xlu0 %5441 }
 0x7c1   : > { %5394 = vmatprep.mubr.f32.mxu1 %v7744_v53 }
 0x7c3   : > { %5807 = vmatmul.mubr.msk.f32.gmra.mxu0 %vm4992_vm6, %v5200_v56 }
 0x7c4   : > { %5811 = vmatmul.mubr.msk.f32.gmra.mxu1 %vm4992_vm6, %v5200_v56  ;;  %5311 = vmatprep.mubr.f32.mxu0 %v7744_v53 }
 0x7c5   : > { %5400 = vmatprep.mubr.f32.mxu1 %v7744_v53 }
 0x7c7   : > { %5808 = vmatmul.mubr.msk.f32.gmra.mxu0 %vm4992_vm6, %v5201_v35 }
 0x7c8   : > { %5812 = vmatmul.mubr.msk.f32.gmra.mxu1 %vm4992_vm6, %v5201_v35  ;;  %5317 = vmatprep.mubr.f32.mxu0 %v7744_v53 }
 0x7c9   : > { %5406 = vmatprep.mubr.f32.mxu1 %v7744_v53 }
 0x7cb   : > { %5809 = vmatmul.mubr.msk.f32.gmra.mxu0 %vm4992_vm6, %v5202_v5 }
 0x7cc   : > { %5813 = vmatmul.mubr.msk.f32.gmra.mxu1 %vm4992_vm6, %v5202_v5 }
 0x87f   : > { %v5301_v33 = vpop.f32.mrf.mxu0 }
 0x880   : > { %v5390_v12 = vpop.f32.mrf.mxu1  ;;  %v5302_v39 = vadd.f32 %v5301_v33, %v5206_v49  ;;  %v5447_v33 = vpop.permute.xlu0 %5446 }
 0x881   : > { %v5391_v17 = vadd.f32 %v5390_v12, %v5206_v49  ;;  %v5303_v34 = vpop.f32.mrf.mxu0 }
 0x882   : > { %v5304_v29 = vadd.f32 %v5303_v34, %v5206_v49  ;;  %v5392_v36 = vpop.f32.mrf.mxu1  ;;  %v5413_v53 = vmax.f32 %v5302_v39, 0.0 }
 0x883   : > { %v5393_v25 = vadd.f32 %v5392_v36, %v5206_v49  ;;  %v5307_v18 = vpop.f32.mrf.mxu0  ;;  %v5415_v48 = vmax.f32 %v5391_v17, 0.0 }
 0x884   : > { %v5308_v42 = vadd.f32 %v5307_v18, %v7520_v24  ;;  %v5396_v28 = vpop.f32.mrf.mxu1  ;;  %v5414_v20 = vmax.f32 %v5304_v29, 0.0  ;;  %v5449_v62 = vmul.f32 %v5432_v37, %v5413_v53 }
 0x885   : > { %v5397_v19 = vadd.f32 %v5396_v28, %v7520_v24  ;;  %v5309_v50 = vpop.f32.mrf.mxu0  ;;  %v5416_v40 = vmax.f32 %v5393_v25, 0.0  ;;  %v5451_v52 = vmul.f32 %v5432_v37, %v5415_v48 }
 0x886   : > { %v5417_v47 = vmax.f32 %v5308_v42, 0.0  ;;  %v5310_v57 = vadd.f32 %v5309_v50, %v7520_v24  ;;  %v5398_v51 = vpop.f32.mrf.mxu1  ;;  %v5450_v45 = vmul.f32 %v5432_v37, %v5414_v20 }
 0x887   : > { %v5419_v8 = vmax.f32 %v5397_v19, 0.0  ;;  %v5399_v32 = vadd.f32 %v5398_v51, %v7520_v24  ;;  %v5313_v0 = vpop.f32.mrf.mxu0  ;;  %v5452_v63 = vmul.f32 %v5432_v37, %v5416_v40 }
 0x888   : > { %v5418_v15 = vmax.f32 %v5310_v57, 0.0  ;;  %v5314_v58 = vadd.f32 %v5313_v0, %v5216_v14  ;;  %v5402_v21 = vpop.f32.mrf.mxu1  ;;  %v5453_v26 = vmul.f32 %v7524_v54, %v5417_v47 }
 0x889   : > { %v5420_v22 = vmax.f32 %v5399_v32, 0.0  ;;  %v5403_v23 = vadd.f32 %v5402_v21, %v5216_v14  ;;  %v5315_v13 = vpop.f32.mrf.mxu0  ;;  %v5455_v3 = vmul.f32 %v7524_v54, %v5419_v8 }
 0x88a   : > { %v5421_v1 = vmax.f32 %v5314_v58, 0.0  ;;  %v5316_v2 = vadd.f32 %v5315_v13, %v5216_v14  ;;  %v5404_v31 = vpop.f32.mrf.mxu1  ;;  %v5454_v38 = vmul.f32 %v7524_v54, %v5418_v15  ;;  %v5465_v56 = vadd.f32 %v5453_v26, %v5449_v62 }
 0x88b   : > { %v5423_v24 = vmax.f32 %v5403_v23, 0.0  ;;  %v5405_v16 = vadd.f32 %v5404_v31, %v5216_v14  ;;  %v5319_v59 = vpop.f32.mrf.mxu0  ;;  %v5456_v55 = vmul.f32 %v7524_v54, %v5420_v22  ;;  %v5483_v12 = vadd.f32 %v5455_v3, %v5451_v52  ;;  %v5504_v3 = vpop.permute.xlu1 %5503 }
 0x88c   : > { %v5457_v46 = vmul.f32 %v5442_v43, %v5421_v1  ;;  %v5422_v6 = vmax.f32 %v5316_v2, 0.0  ;;  %v5320_v27 = vadd.f32 %v5319_v59, %v7522_v44  ;;  %v5408_v9 = vpop.f32.mrf.mxu1  ;;  %v5474_v29 = vadd.f32 %v5454_v38, %v5450_v45 }
 0x88d   : > { %v5459_v4 = vmul.f32 %v5442_v43, %v5423_v24  ;;  %v5424_v30 = vmax.f32 %v5405_v16, 0.0  ;;  %v5409_v41 = vadd.f32 %v5408_v9, %v7522_v44  ;;  %v5321_v10 = vpop.f32.mrf.mxu0  ;;  %v5492_v25 = vadd.f32 %v5456_v55, %v5452_v63 }
 0x88e   : > { %v5458_v35 = vmul.f32 %v5442_v43, %v5422_v6  ;;  %v5425_v5 = vmax.f32 %v5320_v27, 0.0  ;;  %v5322_v49 = vadd.f32 %v5321_v10, %v7522_v44  ;;  %v5410_v14 = vpop.f32.mrf.mxu1  ;;  %v5466_v36 = vadd.f32 %v5465_v56, %v5457_v46 }
 0x88f   : > { %v5460_v39 = vmul.f32 %v5442_v43, %v5424_v30  ;;  %v5427_v17 = vmax.f32 %v5409_v41, 0.0  ;;  %v5411_v34 = vadd.f32 %v5410_v14, %v7522_v44  ;;  %v5484_v18 = vadd.f32 %v5483_v12, %v5459_v4 }
 0x890   : > { %v5461_v54 = vmul.f32 %v5447_v33, %v5425_v5  ;;  %v5426_v37 = vmax.f32 %v5322_v49, 0.0  ;;  %v5475_v53 = vadd.f32 %v5474_v29, %v5458_v35  ;;  %v7956_v35 = vld [vmem:[#allocation13_spill] sm:$0xff] }
 0x891   : > { %v5463_v42 = vmul.f32 %v5447_v33, %v5427_v17  ;;  %v5428_v28 = vmax.f32 %v5411_v34, 0.0  ;;  %v5493_v50 = vadd.f32 %v5492_v25, %v5460_v39 }
 0x892   : > { %v5467_v48 = vadd.f32 %v5466_v36, %v5461_v54  ;;  %v5462_v19 = vmul.f32 %v5447_v33, %v5426_v37 }
 0x893   : > { %v5485_v20 = vadd.f32 %v5484_v18, %v5463_v42  ;;  %v5464_v47 = vmul.f32 %v5447_v33, %v5428_v28  ;;  %v7957_v33 = vlaneseq }
 0x894   : > { %v5468_v57 = vrot.slane %v5467_v48, 4  ;;  %v5476_v51 = vadd.f32 %v5475_v53, %v5462_v19 }
 0x895   : > { %v5486_v40 = vrot.slane %v5485_v20, 4  ;;  %v5494_v8 = vadd.f32 %v5493_v50, %v5464_v47  ;;  %vm5545_vm8 = vcmp.lt.s32.totalorder %v7957_v33, 512 }
 0x896   : > { %v5469_v32 = vadd.f32 %v5468_v57, %v5467_v48  ;;  %v5477_v44 = vrot.slane %v5476_v51, 4 }
 0x897   : > { %v5487_v0 = vadd.f32 %v5486_v40, %v5485_v20  ;;  %v5495_v15 = vrot.slane %v5494_v8, 4 }
 0x898   : > { %v5470_v58 = vrot.slane %v5469_v32, 2  ;;  %v5478_v21 = vadd.f32 %v5477_v44, %v5476_v51 }
 0x899   : > { %v5488_v43 = vrot.slane %v5487_v0, 2  ;;  %v5496_v62 = vadd.f32 %v5495_v15, %v5494_v8 }
 0x89a   : > { %v5471_v52 = vadd.f32 %v5470_v58, %v5469_v32  ;;  %v5479_v22 = vrot.slane %v5478_v21, 2 }
 0x89b   : > { %v5489_v23 = vadd.f32 %v5488_v43, %v5487_v0  ;;  %v5497_v13 = vrot.slane %v5496_v62, 2 }
 0x89c   : > { %v5472_v45 = vrot.slane %v5471_v52, 1  ;;  %v5480_v26 = vadd.f32 %v5479_v22, %v5478_v21 }
 0x89d   : > { %v5490_v1 = vrot.slane %v5489_v23, 1  ;;  %v5498_v2 = vadd.f32 %v5497_v13, %v5496_v62 }
 0x89e   : > { %v5473_v31 = vadd.f32 %v5472_v45, %v5471_v52  ;;  %v5481_v63 = vrot.slane %v5480_v26, 1 }
 0x89f   : > { %v5491_v24 = vadd.f32 %v5490_v1, %v5489_v23  ;;  %v5499_v16 = vrot.slane %v5498_v2, 1 }
 0x8a0   : > { %v5506_v59 = vadd.f32 %v5504_v3, %v5473_v31  ;;  %v5482_v38 = vadd.f32 %v5481_v63, %v5480_v26 }
 0x8a1   : > { %v5508_v46 = vadd.f32 %v5504_v3, %v5491_v24  ;;  %v5500_v6 = vadd.f32 %v5499_v16, %v5498_v2 }
 0x8a2   : > { %v5507_v27 = vadd.f32 %v5504_v3, %v5482_v38  ;;  %v5510_v55 = vadd.f32 %v5506_v59, %v7546_v11 }
 0x8a3   : > { %v5509_v9 = vadd.f32 %v5504_v3, %v5500_v6  ;;  %v5512_v30 = vadd.f32 %v5508_v46, %v7548_v60 }
 0x8a4   : > { %v5511_v4 = vadd.f32 %v5507_v27, %v7550_v61 }
 0x8a5   : > { %v5513_v41 = vadd.f32 %v5509_v9, %v7552_v7 }
 0x8a6   : > { %v5518_v10 = vcombine.low %v5510_v55, %v5511_v4 }
 0x8a7   : > { %v5519_v56 = vcombine.low %v5512_v30, %v5513_v41 }
 0x8a8   : > { %v5526_v5 = vrot.slane %v5518_v10, %v7956_v35 }
 0x8a9   : > { %v5533_v49 = vrot.slane %v5519_v56, %v7956_v35 }
 0x8ab   : > { %v5534_v14 = vcombine.low %v5526_v5, %v5533_v49 }
 0x8ad   : > { %v5541_v11 = vrot.slane %v5534_v14, %v7956_v35 }
 0x8af   : > { %5547 = vst.msk [vmem:[%s277_s13] sm:$0xf] %vm5545_vm8, %v5541_v11 }
 0x8b0 PF: > { %s22_s26 = sadd.s32 1, %s5877_s26  }
 0x8b1   : > { %p19_p5 = scmp.ge.s32.totalorder %s22_s26, 4  }
 0x8b3   :  { %21 = sbr.rel (!%p19_p5) target bundleno = 5 (0x5), region = 104 }

</bundles_post_ra>
